<compile_context>
chip_gen: v5e
topology: v5e:2x2
jax: 0.10.0
libtpu: 0.0.40
codegen_flags: <defaults>
</compile_context>

<pallas_src>
import functools
import math

import jax
import jax.numpy as jnp
from jax.experimental import pallas as pl
from jax.experimental.pallas import tpu as pltpu

# ----------------------------- config ---------------------------------------
BATCH = 8
LATENT_DIM = 32
HIDDEN_DIM = 64
N_LAYERS = 2
TIME_EMBED_DIM = 32
SIGMA = 0.2
SINKHORN_ITERS = 200
# TODO(synk): nn.Dropout in train mode is stochastic; config.dropout=0.0 here,
#             so Dropout == Identity (matches eval semantics exactly).

_VMEM = pl.BlockSpec(memory_space=pltpu.MemorySpace.VMEM)


# --------------------------- in-kernel helpers -------------------------------
def _erf(x):
    # Abramowitz & Stegun 7.1.26 polynomial approximation (|err| <= 1.5e-7),
    # built only from exp/abs/where which lower cleanly on the TPU VPU/EUP.
    a1, a2, a3, a4, a5 = 0.254829592, -0.284496736, 1.421413741, -1.453152027, 1.061405429
    p = 0.3275911
    s = jnp.where(x >= 0.0, 1.0, -1.0)
    ax = jnp.abs(x)
    t = 1.0 / (1.0 + p * ax)
    poly = ((((a5 * t + a4) * t + a3) * t + a2) * t + a1) * t
    return s * (1.0 - poly * jnp.exp(-ax * ax))


def _gelu(x):
    # exact (erf-based) GELU, matching torch.nn.GELU() default
    return 0.5 * x * (1.0 + _erf(x * 0.7071067811865476))


def _layernorm(x, gamma, beta, eps=1e-5):
    mean = jnp.mean(x, axis=-1, keepdims=True)
    xc = x - mean
    var = jnp.mean(xc * xc, axis=-1, keepdims=True)
    return xc * jax.lax.rsqrt(var + eps) * gamma + beta


# ------------------ kernel 1: cost matrix + log-domain Sinkhorn --------------
def _plan_kernel(src_ref, tgt_ref, logp_ref, *, sigma, n_iters):
    src = src_ref[...]
    tgt = tgt_ref[...]
    b = src.shape[0]
    dn = (((1,), (1,)), ((), ()))  # contract feature dims

    # pairwise squared-euclidean cost (torch.cdist(x0, x1) ** 2), on the MXU
    cross = jax.lax.dot_general(src, tgt, dn, preferred_element_type=jnp.float32)       # (B,B)
    sq0 = jnp.sum(src * src, axis=-1, keepdims=True)                                     # (B,1)
    ones = jnp.ones((1, src.shape[-1]), jnp.float32)
    sq1 = jax.lax.dot_general(ones, tgt * tgt, dn, preferred_element_type=jnp.float32)   # (1,B)
    cost = jnp.maximum(sq0 + sq1 - 2.0 * cross, 0.0)

    # log-domain Sinkhorn with uniform marginals, reg = 2*sigma^2.  The whole
    # 200-iteration loop runs on vregs inside this kernel; nothing touches HBM.
    reg = 2.0 * sigma * sigma
    m = cost * (-1.0 / reg)                      # scaled logits  M = -cost/reg
    log_a = -math.log(b)
    log_b = -math.log(b)

    def lse_lanes(x):       # logsumexp over last axis  -> (B,1)
        mx = jnp.max(x, axis=-1, keepdims=True)
        return mx + jnp.log(jnp.sum(jnp.exp(x - mx), axis=-1, keepdims=True))

    def lse_sublanes(x):    # logsumexp over first axis -> (1,B)
        mx = jnp.max(x, axis=0, keepdims=True)
        return mx + jnp.log(jnp.sum(jnp.exp(x - mx), axis=0, keepdims=True))

    def body(_, fg):
        f, g = fg
        f = log_a - lse_lanes(m + g)             # (B,1)   (f_scaled = f/reg)
        g = log_b - lse_sublanes(m + f)          # (1,B)   (g_scaled = g/reg)
        return f, g

    f, g = jax.lax.fori_loop(
        0, n_iters, body,
        (jnp.zeros((b, 1), jnp.float32), jnp.zeros((1, b), jnp.float32)))

    logp_ref[...] = m + f + g                    # log of (unnormalized) OT plan


def sinkhorn_log_plan(source, target, sigma, n_iters=SINKHORN_ITERS):
    b = source.shape[0]
    kernel = functools.partial(_plan_kernel, sigma=sigma, n_iters=n_iters)
    return pl.pallas_call(
        kernel,
        out_shape=jax.ShapeDtypeStruct((b, b), jnp.float32),
        in_specs=[_VMEM, _VMEM],
        out_specs=_VMEM,
    )(source, target)


# -------- kernel 2: coupling gather + bridge sample + velocity network -------
def _sb_flow_kernel(
    i_ref, j_ref, src_ref, tgt_ref, t_ref, eps_ref,
    te_w0_ref, te_b0_ref, te_g_ref, te_be_ref, te_w1_ref, te_b1_ref,
    w0_ref, b0_ref, g0_ref, be0_ref,
    w1_ref, b1_ref, g1_ref, be1_ref,
    w2_ref, b2_ref, g2_ref, be2_ref,
    out_ref, hcat_ref,
    *, sigma,
):
    b, ld = src_ref.shape

    # --- fused coupling gather: x0 = source[i], x1 = target[j] ---------------
    # one-hot selection matrices (iota + int compare) + MXU matmul.  No XLA
    # gather ops, no extra HBM round-trip of x0/x1 between dispatches.
    lanes = jax.lax.broadcasted_iota(jnp.int32, (b, b), 1)
    oh_i = (lanes == i_ref[...]).astype(jnp.float32)      # (B,B)
    oh_j = (lanes == j_ref[...]).astype(jnp.float32)      # (B,B)
    x0 = jnp.dot(oh_i, src_ref[...], preferred_element_type=jnp.float32)
    x1 = jnp.dot(oh_j, tgt_ref[...], preferred_element_type=jnp.float32)

    t = t_ref[...]          # (B,1), broadcast over the feature lanes
    eps = eps_ref[...]

    # --- Schrödinger-bridge conditional path sampling ------------------------
    mu_t = t * x1 + (1.0 - t) * x0
    sigma_t = sigma * jnp.sqrt(t * (1.0 - t))
    xt = mu_t + sigma_t * eps
    ut = (1.0 - 2.0 * t) / (2.0 * t * (1.0 - t) + 1e-8) * (xt - mu_t) + (x1 - x0)

    # --- time encoder: Linear(1, TE) -> LayerNorm -> GELU -> Linear(TE, L) ---
    # in_features == 1, so the first Linear is a broadcast multiply.
    h = t * te_w0_ref[...] + te_b0_ref[...]                       # (B, TE)
    h = _gelu(_layernorm(h, te_g_ref[...], te_be_ref[...]))
    t_emb = jnp.dot(h, te_w1_ref[...], preferred_element_type=jnp.float32) + te_b1_ref[...]

    # --- layer 0: cat([xt, ut, t_emb]) built in a VMEM scratch, single MXU pass
    hcat_ref[:, 0 * ld:1 * ld] = xt
    hcat_ref[:, 1 * ld:2 * ld] = ut
    hcat_ref[:, 2 * ld:3 * ld] = t_emb
    z = jnp.dot(hcat_ref[...], w0_ref[...], preferred_element_type=jnp.float32) + b0_ref[...]
    h = _gelu(_layernorm(z, g0_ref[...], be0_ref[...]))

    # --- layer 1 --------------------------------------------------------------
    z = jnp.dot(h, w1_ref[...], preferred_element_type=jnp.float32) + b1_ref[...]
    h = _gelu(_layernorm(z, g1_ref[...], be1_ref[...]))

    # --- layer 2 (final: LayerNorm -> Tanh) -----------------------------------
    z = jnp.dot(h, w2_ref[...], preferred_element_type=jnp.float32) + b2_ref[...]
    v = jnp.tanh(_layernorm(z, g2_ref[...], be2_ref[...]))

    # --- packed output [v | xt]: one (B, 2L) ref, half the masked stores ------
    out_ref[:, 0:ld] = v
    out_ref[:, ld:2 * ld] = xt


def sb_flow_pallas(i_idx, j_idx, source, target, t2d, eps, params, sigma):
    b, ld = source.shape
    n_in = 6 + len(params)
    kernel = functools.partial(_sb_flow_kernel, sigma=sigma)
    packed = pl.pallas_call(
        kernel,
        out_shape=jax.ShapeDtypeStruct((b, 2 * ld), jnp.float32),
        in_specs=[_VMEM] * n_in,
        out_specs=_VMEM,
        scratch_shapes=[pltpu.VMEM((b, 3 * ld), jnp.float32)],
    )(i_idx, j_idx, source, target, t2d, eps, *params)
    return packed[:, :ld], packed[:, ld:]


# --------------------------- jitted forward ----------------------------------
@functools.partial(jax.jit, static_argnames=("sigma",))
def schrodinger_bridge_flow_forward(source, target, params, key, *, sigma):
    """Mirrors SchrodingerBridgeFlow.forward(source, target) -> (v, xt, t)."""
    b, ld = source.shape

    # Pallas kernel 1: cost matrix + 200-iteration log-domain Sinkhorn, fused.
    log_plan = sinkhorn_log_plan(source, target, sigma)

    # OTPlanSampler coupling sampling + bridge randomness.  jax.random streams
    # necessarily differ from np/torch RNG.
    k_pair, k_t, k_eps = jax.random.split(key, 3)
    flat = jax.random.categorical(k_pair, log_plan.reshape(-1), shape=(b,))
    i_idx = (flat // b).astype(jnp.int32).reshape(b, 1)
    j_idx = (flat % b).astype(jnp.int32).reshape(b, 1)
    t = jax.random.uniform(k_t, (b,), dtype=jnp.float32)
    eps = jax.random.normal(k_eps, (b, ld), dtype=jnp.float32)

    # Pallas kernel 2: gather + bridge sampling + time encoder + velocity MLP.
    v, xt = sb_flow_pallas(i_idx, j_idx, source, target, t[:, None], eps, params, sigma)

    # TODO(synk): return_regularization branch (path-length / Jacobian reg) not
    #             implemented; forward() default path returns (v, xt, t).
    # TODO(synk): stretch goal — fold categorical/uniform/normal sampling into
    #             kernel 2 via pltpu.prng_* for a single-dispatch forward.
    return v, xt, t


# --------------------------- parameter init ----------------------------------
def init_params(key, latent_dim, hidden_dim, n_layers, time_embed_dim):
    keys = jax.random.split(key, 2 + (n_layers + 1))
    kit = iter(keys)

    def linear(k, fan_in, fan_out):
        k1, k2 = jax.random.split(k)
        bound = 1.0 / math.sqrt(fan_in)
        w = jax.random.uniform(k1, (fan_in, fan_out), jnp.float32, -bound, bound)
        b = jax.random.uniform(k2, (1, fan_out), jnp.float32, -bound, bound)
        return w, b

    params = []
    # time encoder: Linear(1, TE), LayerNorm(TE), GELU, Linear(TE, L)
    w, bb = linear(next(kit), 1, time_embed_dim)
    params += [w, bb, jnp.ones((1, time_embed_dim), jnp.float32),
               jnp.zeros((1, time_embed_dim), jnp.float32)]
    w, bb = linear(next(kit), time_embed_dim, latent_dim)
    params += [w, bb]

    # net: dims = [3*L] + [H]*n_layers + [L]; Linear + LayerNorm per layer
    dims = [3 * latent_dim] + [hidden_dim] * n_layers + [latent_dim]
    for li in range(len(dims) - 1):
        w, bb = linear(next(kit), dims[li], dims[li + 1])
        params += [w, bb, jnp.ones((1, dims[li + 1]), jnp.float32),
                   jnp.zeros((1, dims[li + 1]), jnp.float32)]
    return params


# ------------------------------- main ----------------------------------------
if __name__ == "__main__":
    root = jax.random.PRNGKey(0)
    k_param, k_src, k_tgt, k_fwd = jax.random.split(root, 4)

    source = jax.random.normal(k_src, (BATCH, LATENT_DIM), jnp.float32)
    target = jax.random.normal(k_tgt, (BATCH, LATENT_DIM), jnp.float32) + 1.0

    params = init_params(k_param, LATENT_DIM, HIDDEN_DIM, N_LAYERS, TIME_EMBED_DIM)

    v, xt, t = schrodinger_bridge_flow_forward(source, target, params, k_fwd, sigma=SIGMA)
    jax.block_until_ready((v, xt, t))

    assert v.shape == (BATCH, LATENT_DIM)
    assert xt.shape == (BATCH, LATENT_DIM)
    assert t.shape == (BATCH,)
    assert bool(jnp.all(jnp.isfinite(v)))
    assert bool(jnp.all(jnp.isfinite(xt)))
    assert bool(jnp.all(jnp.abs(v) <= 1.0))  # final Tanh

    print("KERNEL_OK")
</pallas_src>

<mosaic_0001>
module attributes {stable_mosaic.version = 11 : i64} {
  func.func @_plan_kernel(%arg0: memref<8x32xf32, #tpu.memory_space<vmem>>, %arg1: memref<8x32xf32, #tpu.memory_space<vmem>>, %arg2: memref<8x8xf32, #tpu.memory_space<vmem>>) attributes {dimension_semantics = [], scalar_prefetch = 0 : i64, scratch_operands = 0 : i64, tpu.core_type = #tpu.core_type<tc>} {
    %c0 = arith.constant 0 : index
    %c0_0 = arith.constant 0 : index
    %0 = vector.load %arg0[%c0, %c0_0] : memref<8x32xf32, #tpu.memory_space<vmem>>, vector<8x32xf32>
    %c0_1 = arith.constant 0 : index
    %c0_2 = arith.constant 0 : index
    %1 = vector.load %arg1[%c0_1, %c0_2] : memref<8x32xf32, #tpu.memory_space<vmem>>, vector<8x32xf32>
    %cst = arith.constant dense<0.000000e+00> : vector<8x8xf32>
    %2 = tpu.matmul %0, %1, %cst {dimension_numbers = #tpu.dot_dimension_numbers<[1], [1], [0], [0], [0, 0, 1, 0], [], []>} : vector<8x32xf32>, vector<8x32xf32>, vector<8x8xf32> -> vector<8x8xf32>
    %3 = arith.mulf %0, %0 : vector<8x32xf32>
    %cst_3 = arith.constant dense<0.000000e+00> : vector<8xf32>
    %4 = vector.multi_reduction <add>, %3, %cst_3 [1] : vector<8x32xf32> to vector<8xf32>
    %5 = vector.shape_cast %4 : vector<8xf32> to vector<8x1xf32>
    %cst_4 = arith.constant 1.000000e+00 : f32
    %6 = vector.broadcast %cst_4 : f32 to vector<1x32xf32>
    %7 = arith.mulf %1, %1 : vector<8x32xf32>
    %cst_5 = arith.constant dense<0.000000e+00> : vector<1x8xf32>
    %8 = tpu.matmul %6, %7, %cst_5 {dimension_numbers = #tpu.dot_dimension_numbers<[1], [1], [0], [0], [0, 0, 1, 0], [], []>} : vector<1x32xf32>, vector<8x32xf32>, vector<1x8xf32> -> vector<1x8xf32>
    %9 = vector.broadcast %5 : vector<8x1xf32> to vector<8x8xf32>
    %10 = vector.broadcast %8 : vector<1x8xf32> to vector<8x8xf32>
    %11 = arith.addf %9, %10 : vector<8x8xf32>
    %cst_6 = arith.constant 2.000000e+00 : f32
    %12 = vector.broadcast %cst_6 : f32 to vector<8x8xf32>
    %13 = arith.mulf %12, %2 : vector<8x8xf32>
    %14 = arith.subf %11, %13 : vector<8x8xf32>
    %cst_7 = arith.constant 0.000000e+00 : f32
    %15 = vector.broadcast %cst_7 : f32 to vector<8x8xf32>
    %16 = arith.maximumf %14, %15 : vector<8x8xf32>
    %cst_8 = arith.constant -1.250000e+01 : f32
    %17 = vector.broadcast %cst_8 : f32 to vector<8x8xf32>
    %18 = arith.mulf %16, %17 : vector<8x8xf32>
    %cst_9 = arith.constant 0.000000e+00 : f32
    %19 = vector.broadcast %cst_9 : f32 to vector<8x1xf32>
    %cst_10 = arith.constant 0.000000e+00 : f32
    %20 = vector.broadcast %cst_10 : f32 to vector<1x8xf32>
    %c0_i32 = arith.constant 0 : i32
    %c200_i32 = arith.constant 200 : i32
    %21 = arith.addi %c0_i32, %c200_i32 : i32
    %c1_i32 = arith.constant 1 : i32
    %22:2 = scf.for %arg3 = %c0_i32 to %21 step %c1_i32 iter_args(%arg4 = %19, %arg5 = %20) -> (vector<8x1xf32>, vector<1x8xf32>)  : i32 {
      %28 = vector.broadcast %arg5 : vector<1x8xf32> to vector<8x8xf32>
      %29 = arith.addf %18, %28 : vector<8x8xf32>
      %cst_13 = arith.constant dense<0xFF800000> : vector<8xf32>
      %30 = vector.multi_reduction <maximumf>, %29, %cst_13 [1] : vector<8x8xf32> to vector<8xf32>
      %31 = vector.shape_cast %30 : vector<8xf32> to vector<8x1xf32>
      %32 = vector.broadcast %31 : vector<8x1xf32> to vector<8x8xf32>
      %33 = arith.subf %29, %32 : vector<8x8xf32>
      %34 = math.exp %33 : vector<8x8xf32>
      %cst_14 = arith.constant dense<0.000000e+00> : vector<8xf32>
      %35 = vector.multi_reduction <add>, %34, %cst_14 [1] : vector<8x8xf32> to vector<8xf32>
      %36 = vector.shape_cast %35 : vector<8xf32> to vector<8x1xf32>
      %37 = math.log %36 : vector<8x1xf32>
      %38 = arith.addf %31, %37 : vector<8x1xf32>
      %cst_15 = arith.constant -2.07944155 : f32
      %39 = vector.broadcast %cst_15 : f32 to vector<8x1xf32>
      %40 = arith.subf %39, %38 : vector<8x1xf32>
      %41 = vector.broadcast %40 : vector<8x1xf32> to vector<8x8xf32>
      %42 = arith.addf %18, %41 : vector<8x8xf32>
      %cst_16 = arith.constant dense<0xFF800000> : vector<8xf32>
      %43 = vector.multi_reduction <maximumf>, %42, %cst_16 [0] : vector<8x8xf32> to vector<8xf32>
      %44 = vector.shape_cast %43 : vector<8xf32> to vector<1x8xf32>
      %45 = vector.broadcast %44 : vector<1x8xf32> to vector<8x8xf32>
      %46 = arith.subf %42, %45 : vector<8x8xf32>
      %47 = math.exp %46 : vector<8x8xf32>
      %cst_17 = arith.constant dense<0.000000e+00> : vector<8xf32>
      %48 = vector.multi_reduction <add>, %47, %cst_17 [0] : vector<8x8xf32> to vector<8xf32>
      %49 = vector.shape_cast %48 : vector<8xf32> to vector<1x8xf32>
      %50 = math.log %49 : vector<1x8xf32>
      %51 = arith.addf %44, %50 : vector<1x8xf32>
      %cst_18 = arith.constant -2.07944155 : f32
      %52 = vector.broadcast %cst_18 : f32 to vector<1x8xf32>
      %53 = arith.subf %52, %51 : vector<1x8xf32>
      scf.yield %40, %53 : vector<8x1xf32>, vector<1x8xf32>
    }
    %23 = vector.broadcast %22#0 : vector<8x1xf32> to vector<8x8xf32>
    %24 = arith.addf %18, %23 : vector<8x8xf32>
    %25 = vector.broadcast %22#1 : vector<1x8xf32> to vector<8x8xf32>
    %26 = arith.addf %24, %25 : vector<8x8xf32>
    %c0_11 = arith.constant 0 : index
    %c0_12 = arith.constant 0 : index
    %27 = vector.load %arg2[%c0_11, %c0_12] : memref<8x8xf32, #tpu.memory_space<vmem>>, vector<8x8xf32>
    tpu.vector_store %arg2[%c0_11, %c0_12], %26 {strides = array<i32>} : memref<8x8xf32, #tpu.memory_space<vmem>>, vector<8x8xf32>,
    return
  }
}

module attributes {stable_mosaic.version = 11 : i64} {
  func.func @_sb_flow_kernel(%arg0: memref<8x1xi32, #tpu.memory_space<vmem>>, %arg1: memref<8x1xi32, #tpu.memory_space<vmem>>, %arg2: memref<8x32xf32, #tpu.memory_space<vmem>>, %arg3: memref<8x32xf32, #tpu.memory_space<vmem>>, %arg4: memref<8x1xf32, #tpu.memory_space<vmem>>, %arg5: memref<8x32xf32, #tpu.memory_space<vmem>>, %arg6: memref<1x32xf32, #tpu.memory_space<vmem>>, %arg7: memref<1x32xf32, #tpu.memory_space<vmem>>, %arg8: memref<1x32xf32, #tpu.memory_space<vmem>>, %arg9: memref<1x32xf32, #tpu.memory_space<vmem>>, %arg10: memref<32x32xf32, #tpu.memory_space<vmem>>, %arg11: memref<1x32xf32, #tpu.memory_space<vmem>>, %arg12: memref<96x64xf32, #tpu.memory_space<vmem>>, %arg13: memref<1x64xf32, #tpu.memory_space<vmem>>, %arg14: memref<1x64xf32, #tpu.memory_space<vmem>>, %arg15: memref<1x64xf32, #tpu.memory_space<vmem>>, %arg16: memref<64x64xf32, #tpu.memory_space<vmem>>, %arg17: memref<1x64xf32, #tpu.memory_space<vmem>>, %arg18: memref<1x64xf32, #tpu.memory_space<vmem>>, %arg19: memref<1x64xf32, #tpu.memory_space<vmem>>, %arg20: memref<64x32xf32, #tpu.memory_space<vmem>>, %arg21: memref<1x32xf32, #tpu.memory_space<vmem>>, %arg22: memref<1x32xf32, #tpu.memory_space<vmem>>, %arg23: memref<1x32xf32, #tpu.memory_space<vmem>>, %arg24: memref<8x64xf32, #tpu.memory_space<vmem>>, %arg25: memref<8x96xf32, #tpu.memory_space<vmem>>) attributes {dimension_semantics = [], scalar_prefetch = 0 : i64, scratch_operands = 1 : i64, tpu.core_type = #tpu.core_type<tc>} {
    %0 = tpu.iota {dimensions = array<i32: 1>} : vector<8x8xi32>
    %c0 = arith.constant 0 : index
    %c0_0 = arith.constant 0 : index
    %1 = vector.load %arg0[%c0, %c0_0] : memref<8x1xi32, #tpu.memory_space<vmem>>, vector<8x1xi32>
    %2 = vector.broadcast %1 : vector<8x1xi32> to vector<8x8xi32>
    %3 = arith.cmpi eq, %0, %2 : vector<8x8xi32>
    %4 = arith.extui %3 : vector<8x8xi1> to vector<8x8xi32>
    %5 = arith.sitofp %4 : vector<8x8xi32> to vector<8x8xf32>
    %c0_1 = arith.constant 0 : index
    %c0_2 = arith.constant 0 : index
    %6 = vector.load %arg1[%c0_1, %c0_2] : memref<8x1xi32, #tpu.memory_space<vmem>>, vector<8x1xi32>
    %7 = vector.broadcast %6 : vector<8x1xi32> to vector<8x8xi32>
    %8 = arith.cmpi eq, %0, %7 : vector<8x8xi32>
    %9 = arith.extui %8 : vector<8x8xi1> to vector<8x8xi32>
    %10 = arith.sitofp %9 : vector<8x8xi32> to vector<8x8xf32>
    %c0_3 = arith.constant 0 : index
    %c0_4 = arith.constant 0 : index
    %11 = vector.load %arg2[%c0_3, %c0_4] : memref<8x32xf32, #tpu.memory_space<vmem>>, vector<8x32xf32>
    %cst = arith.constant dense<0.000000e+00> : vector<8x32xf32>
    %12 = tpu.matmul %5, %11, %cst {dimension_numbers = #tpu.dot_dimension_numbers<[1], [0], [0], [1], [0, 0, 1, 1], [], []>} : vector<8x8xf32>, vector<8x32xf32>, vector<8x32xf32> -> vector<8x32xf32>
    %c0_5 = arith.constant 0 : index
    %c0_6 = arith.constant 0 : index
    %13 = vector.load %arg3[%c0_5, %c0_6] : memref<8x32xf32, #tpu.memory_space<vmem>>, vector<8x32xf32>
    %cst_7 = arith.constant dense<0.000000e+00> : vector<8x32xf32>
    %14 = tpu.matmul %10, %13, %cst_7 {dimension_numbers = #tpu.dot_dimension_numbers<[1], [0], [0], [1], [0, 0, 1, 1], [], []>} : vector<8x8xf32>, vector<8x32xf32>, vector<8x32xf32> -> vector<8x32xf32>
    %c0_8 = arith.constant 0 : index
    %c0_9 = arith.constant 0 : index
    %15 = vector.load %arg4[%c0_8, %c0_9] : memref<8x1xf32, #tpu.memory_space<vmem>>, vector<8x1xf32>
    %c0_10 = arith.constant 0 : index
    %c0_11 = arith.constant 0 : index
    %16 = vector.load %arg5[%c0_10, %c0_11] : memref<8x32xf32, #tpu.memory_space<vmem>>, vector<8x32xf32>
    %17 = vector.broadcast %15 : vector<8x1xf32> to vector<8x32xf32>
    %18 = arith.mulf %17, %14 : vector<8x32xf32>
    %cst_12 = arith.constant 1.000000e+00 : f32
    %19 = vector.broadcast %cst_12 : f32 to vector<8x1xf32>
    %20 = arith.subf %19, %15 : vector<8x1xf32>
    %21 = vector.broadcast %20 : vector<8x1xf32> to vector<8x32xf32>
    %22 = arith.mulf %21, %12 : vector<8x32xf32>
    %23 = arith.addf %18, %22 : vector<8x32xf32>
    %cst_13 = arith.constant 1.000000e+00 : f32
    %24 = vector.broadcast %cst_13 : f32 to vector<8x1xf32>
    %25 = arith.subf %24, %15 : vector<8x1xf32>
    %26 = arith.mulf %15, %25 : vector<8x1xf32>
    %27 = math.sqrt %26 : vector<8x1xf32>
    %cst_14 = arith.constant 2.000000e-01 : f32
    %28 = vector.broadcast %cst_14 : f32 to vector<8x1xf32>
    %29 = arith.mulf %28, %27 : vector<8x1xf32>
    %30 = vector.broadcast %29 : vector<8x1xf32> to vector<8x32xf32>
    %31 = arith.mulf %30, %16 : vector<8x32xf32>
    %32 = arith.addf %23, %31 : vector<8x32xf32>
    %cst_15 = arith.constant 2.000000e+00 : f32
    %33 = vector.broadcast %cst_15 : f32 to vector<8x1xf32>
    %34 = arith.mulf %33, %15 : vector<8x1xf32>
    %cst_16 = arith.constant 1.000000e+00 : f32
    %35 = vector.broadcast %cst_16 : f32 to vector<8x1xf32>
    %36 = arith.subf %35, %34 : vector<8x1xf32>
    %cst_17 = arith.constant 2.000000e+00 : f32
    %37 = vector.broadcast %cst_17 : f32 to vector<8x1xf32>
    %38 = arith.mulf %37, %15 : vector<8x1xf32>
    %cst_18 = arith.constant 1.000000e+00 : f32
    %39 = vector.broadcast %cst_18 : f32 to vector<8x1xf32>
    %40 = arith.subf %39, %15 : vector<8x1xf32>
    %41 = arith.mulf %38, %40 : vector<8x1xf32>
    %cst_19 = arith.constant 9.99999993E-9 : f32
    %42 = vector.broadcast %cst_19 : f32 to vector<8x1xf32>
    %43 = arith.addf %41, %42 : vector<8x1xf32>
    %44 = arith.divf %36, %43 : vector<8x1xf32>
    %45 = arith.subf %32, %23 : vector<8x32xf32>
    %46 = vector.broadcast %44 : vector<8x1xf32> to vector<8x32xf32>
    %47 = arith.mulf %46, %45 : vector<8x32xf32>
    %48 = arith.subf %14, %12 : vector<8x32xf32>
    %49 = arith.addf %47, %48 : vector<8x32xf32>
    %c0_20 = arith.constant 0 : index
    %c0_21 = arith.constant 0 : index
    %50 = vector.load %arg6[%c0_20, %c0_21] : memref<1x32xf32, #tpu.memory_space<vmem>>, vector<1x32xf32>
    %51 = vector.broadcast %15 : vector<8x1xf32> to vector<8x32xf32>
    %52 = vector.broadcast %50 : vector<1x32xf32> to vector<8x32xf32>
    %53 = arith.mulf %51, %52 : vector<8x32xf32>
    %c0_22 = arith.constant 0 : index
    %c0_23 = arith.constant 0 : index
    %54 = vector.load %arg7[%c0_22, %c0_23] : memref<1x32xf32, #tpu.memory_space<vmem>>, vector<1x32xf32>
    %55 = vector.broadcast %54 : vector<1x32xf32> to vector<8x32xf32>
    %56 = arith.addf %53, %55 : vector<8x32xf32>
    %c0_24 = arith.constant 0 : index
    %c0_25 = arith.constant 0 : index
    %57 = vector.load %arg8[%c0_24, %c0_25] : memref<1x32xf32, #tpu.memory_space<vmem>>, vector<1x32xf32>
    %c0_26 = arith.constant 0 : index
    %c0_27 = arith.constant 0 : index
    %58 = vector.load %arg9[%c0_26, %c0_27] : memref<1x32xf32, #tpu.memory_space<vmem>>, vector<1x32xf32>
    %cst_28 = arith.constant dense<0.000000e+00> : vector<8xf32>
    %59 = vector.multi_reduction <add>, %56, %cst_28 [1] : vector<8x32xf32> to vector<8xf32>
    %60 = vector.shape_cast %59 : vector<8xf32> to vector<8x1xf32>
    %cst_29 = arith.constant 3.200000e+01 : f32
    %61 = vector.broadcast %cst_29 : f32 to vector<8x1xf32>
    %62 = arith.divf %60, %61 : vector<8x1xf32>
    %63 = vector.broadcast %62 : vector<8x1xf32> to vector<8x32xf32>
    %64 = arith.subf %56, %63 : vector<8x32xf32>
    %65 = arith.mulf %64, %64 : vector<8x32xf32>
    %cst_30 = arith.constant dense<0.000000e+00> : vector<8xf32>
    %66 = vector.multi_reduction <add>, %65, %cst_30 [1] : vector<8x32xf32> to vector<8xf32>
    %67 = vector.shape_cast %66 : vector<8xf32> to vector<8x1xf32>
    %cst_31 = arith.constant 3.200000e+01 : f32
    %68 = vector.broadcast %cst_31 : f32 to vector<8x1xf32>
    %69 = arith.divf %67, %68 : vector<8x1xf32>
    %cst_32 = arith.constant 9.99999974E-6 : f32
    %70 = vector.broadcast %cst_32 : f32 to vector<8x1xf32>
    %71 = arith.addf %69, %70 : vector<8x1xf32>
    %72 = math.rsqrt %71 : vector<8x1xf32>
    %73 = vector.broadcast %72 : vector<8x1xf32> to vector<8x32xf32>
    %74 = arith.mulf %64, %73 : vector<8x32xf32>
    %75 = vector.broadcast %57 : vector<1x32xf32> to vector<8x32xf32>
    %76 = arith.mulf %74, %75 : vector<8x32xf32>
    %77 = vector.broadcast %58 : vector<1x32xf32> to vector<8x32xf32>
    %78 = arith.addf %76, %77 : vector<8x32xf32>
    %cst_33 = arith.constant 5.000000e-01 : f32
    %79 = vector.broadcast %cst_33 : f32 to vector<8x32xf32>
    %80 = arith.mulf %79, %78 : vector<8x32xf32>
    %cst_34 = arith.constant 0.707106769 : f32
    %81 = vector.broadcast %cst_34 : f32 to vector<8x32xf32>
    %82 = arith.mulf %78, %81 : vector<8x32xf32>
    %cst_35 = arith.constant 0.000000e+00 : f32
    %83 = vector.broadcast %cst_35 : f32 to vector<8x32xf32>
    %84 = arith.cmpf oge, %82, %83 : vector<8x32xf32>
    %cst_36 = arith.constant 1.000000e+00 : f32
    %cst_37 = arith.constant -1.000000e+00 : f32
    %85 = vector.broadcast %cst_36 : f32 to vector<8x32xf32>
    %86 = vector.broadcast %cst_37 : f32 to vector<8x32xf32>
    %87 = arith.select %84, %85, %86 : vector<8x32xi1>, vector<8x32xf32>
    %88 = math.absf %82 : vector<8x32xf32>
    %cst_38 = arith.constant 0.327591091 : f32
    %89 = vector.broadcast %cst_38 : f32 to vector<8x32xf32>
    %90 = arith.mulf %89, %88 : vector<8x32xf32>
    %cst_39 = arith.constant 1.000000e+00 : f32
    %91 = vector.broadcast %cst_39 : f32 to vector<8x32xf32>
    %92 = arith.addf %91, %90 : vector<8x32xf32>
    %cst_40 = arith.constant 1.000000e+00 : f32
    %93 = vector.broadcast %cst_40 : f32 to vector<8x32xf32>
    %94 = arith.divf %93, %92 : vector<8x32xf32>
    %cst_41 = arith.constant 1.06140542 : f32
    %95 = vector.broadcast %cst_41 : f32 to vector<8x32xf32>
    %96 = arith.mulf %95, %94 : vector<8x32xf32>
    %cst_42 = arith.constant -1.45315206 : f32
    %97 = vector.broadcast %cst_42 : f32 to vector<8x32xf32>
    %98 = arith.addf %96, %97 : vector<8x32xf32>
    %99 = arith.mulf %98, %94 : vector<8x32xf32>
    %cst_43 = arith.constant 1.42141378 : f32
    %100 = vector.broadcast %cst_43 : f32 to vector<8x32xf32>
    %101 = arith.addf %99, %100 : vector<8x32xf32>
    %102 = arith.mulf %101, %94 : vector<8x32xf32>
    %cst_44 = arith.constant -0.284496725 : f32
    %103 = vector.broadcast %cst_44 : f32 to vector<8x32xf32>
    %104 = arith.addf %102, %103 : vector<8x32xf32>
    %105 = arith.mulf %104, %94 : vector<8x32xf32>
    %cst_45 = arith.constant 0.254829586 : f32
    %106 = vector.broadcast %cst_45 : f32 to vector<8x32xf32>
    %107 = arith.addf %105, %106 : vector<8x32xf32>
    %108 = arith.mulf %107, %94 : vector<8x32xf32>
    %cst_46 = arith.constant 0.000000e+00 : f32
    %109 = vector.broadcast %cst_46 : f32 to vector<8x32xf32>
    %110 = arith.subf %109, %88 : vector<8x32xf32>
    %111 = arith.mulf %110, %88 : vector<8x32xf32>
    %112 = math.exp %111 : vector<8x32xf32>
    %113 = arith.mulf %108, %112 : vector<8x32xf32>
    %cst_47 = arith.constant 1.000000e+00 : f32
    %114 = vector.broadcast %cst_47 : f32 to vector<8x32xf32>
    %115 = arith.subf %114, %113 : vector<8x32xf32>
    %116 = arith.mulf %87, %115 : vector<8x32xf32>
    %cst_48 = arith.constant 1.000000e+00 : f32
    %117 = vector.broadcast %cst_48 : f32 to vector<8x32xf32>
    %118 = arith.addf %117, %116 : vector<8x32xf32>
    %119 = arith.mulf %80, %118 : vector<8x32xf32>
    %c0_49 = arith.constant 0 : index
    %c0_50 = arith.constant 0 : index
    %120 = vector.load %arg10[%c0_49, %c0_50] : memref<32x32xf32, #tpu.memory_space<vmem>>, vector<32x32xf32>
    %cst_51 = arith.constant dense<0.000000e+00> : vector<8x32xf32>
    %121 = tpu.matmul %119, %120, %cst_51 {dimension_numbers = #tpu.dot_dimension_numbers<[1], [0], [0], [1], [0, 0, 1, 1], [], []>} : vector<8x32xf32>, vector<32x32xf32>, vector<8x32xf32> -> vector<8x32xf32>
    %c0_52 = arith.constant 0 : index
    %c0_53 = arith.constant 0 : index
    %122 = vector.load %arg11[%c0_52, %c0_53] : memref<1x32xf32, #tpu.memory_space<vmem>>, vector<1x32xf32>
    %123 = vector.broadcast %122 : vector<1x32xf32> to vector<8x32xf32>
    %124 = arith.addf %121, %123 : vector<8x32xf32>
    %c0_54 = arith.constant 0 : index
    %c0_55 = arith.constant 0 : index
    %125 = vector.load %arg25[%c0_54, %c0_55] : memref<8x96xf32, #tpu.memory_space<vmem>>, vector<8x32xf32>
    tpu.vector_store %arg25[%c0_54, %c0_55], %32 {strides = array<i32>} : memref<8x96xf32, #tpu.memory_space<vmem>>, vector<8x32xf32>,
    %c0_56 = arith.constant 0 : index
    %c32 = arith.constant 32 : index
    %126 = vector.load %arg25[%c0_56, %c32] : memref<8x96xf32, #tpu.memory_space<vmem>>, vector<8x32xf32>
    tpu.vector_store %arg25[%c0_56, %c32], %49 {strides = array<i32>} : memref<8x96xf32, #tpu.memory_space<vmem>>, vector<8x32xf32>,
    %c0_57 = arith.constant 0 : index
    %c64 = arith.constant 64 : index
    %127 = vector.load %arg25[%c0_57, %c64] : memref<8x96xf32, #tpu.memory_space<vmem>>, vector<8x32xf32>
    tpu.vector_store %arg25[%c0_57, %c64], %124 {strides = array<i32>} : memref<8x96xf32, #tpu.memory_space<vmem>>, vector<8x32xf32>,
    %c0_58 = arith.constant 0 : index
    %c0_59 = arith.constant 0 : index
    %128 = vector.load %arg25[%c0_58, %c0_59] : memref<8x96xf32, #tpu.memory_space<vmem>>, vector<8x96xf32>
    %c0_60 = arith.constant 0 : index
    %c0_61 = arith.constant 0 : index
    %129 = vector.load %arg12[%c0_60, %c0_61] : memref<96x64xf32, #tpu.memory_space<vmem>>, vector<96x64xf32>
    %cst_62 = arith.constant dense<0.000000e+00> : vector<8x64xf32>
    %130 = tpu.matmul %128, %129, %cst_62 {dimension_numbers = #tpu.dot_dimension_numbers<[1], [0], [0], [1], [0, 0, 1, 1], [], []>} : vector<8x96xf32>, vector<96x64xf32>, vector<8x64xf32> -> vector<8x64xf32>
    %c0_63 = arith.constant 0 : index
    %c0_64 = arith.constant 0 : index
    %131 = vector.load %arg13[%c0_63, %c0_64] : memref<1x64xf32, #tpu.memory_space<vmem>>, vector<1x64xf32>
    %132 = vector.broadcast %131 : vector<1x64xf32> to vector<8x64xf32>
    %133 = arith.addf %130, %132 : vector<8x64xf32>
    %c0_65 = arith.constant 0 : index
    %c0_66 = arith.constant 0 : index
    %134 = vector.load %arg14[%c0_65, %c0_66] : memref<1x64xf32, #tpu.memory_space<vmem>>, vector<1x64xf32>
    %c0_67 = arith.constant 0 : index
    %c0_68 = arith.constant 0 : index
    %135 = vector.load %arg15[%c0_67, %c0_68] : memref<1x64xf32, #tpu.memory_space<vmem>>, vector<1x64xf32>
    %cst_69 = arith.constant dense<0.000000e+00> : vector<8xf32>
    %136 = vector.multi_reduction <add>, %133, %cst_69 [1] : vector<8x64xf32> to vector<8xf32>
    %137 = vector.shape_cast %136 : vector<8xf32> to vector<8x1xf32>
    %cst_70 = arith.constant 6.400000e+01 : f32
    %138 = vector.broadcast %cst_70 : f32 to vector<8x1xf32>
    %139 = arith.divf %137, %138 : vector<8x1xf32>
    %140 = vector.broadcast %139 : vector<8x1xf32> to vector<8x64xf32>
    %141 = arith.subf %133, %140 : vector<8x64xf32>
    %142 = arith.mulf %141, %141 : vector<8x64xf32>
    %cst_71 = arith.constant dense<0.000000e+00> : vector<8xf32>
    %143 = vector.multi_reduction <add>, %142, %cst_71 [1] : vector<8x64xf32> to vector<8xf32>
    %144 = vector.shape_cast %143 : vector<8xf32> to vector<8x1xf32>
    %cst_72 = arith.constant 6.400000e+01 : f32
    %145 = vector.broadcast %cst_72 : f32 to vector<8x1xf32>
    %146 = arith.divf %144, %145 : vector<8x1xf32>
    %cst_73 = arith.constant 9.99999974E-6 : f32
    %147 = vector.broadcast %cst_73 : f32 to vector<8x1xf32>
    %148 = arith.addf %146, %147 : vector<8x1xf32>
    %149 = math.rsqrt %148 : vector<8x1xf32>
    %150 = vector.broadcast %149 : vector<8x1xf32> to vector<8x64xf32>
    %151 = arith.mulf %141, %150 : vector<8x64xf32>
    %152 = vector.broadcast %134 : vector<1x64xf32> to vector<8x64xf32>
    %153 = arith.mulf %151, %152 : vector<8x64xf32>
    %154 = vector.broadcast %135 : vector<1x64xf32> to vector<8x64xf32>
    %155 = arith.addf %153, %154 : vector<8x64xf32>
    %cst_74 = arith.constant 5.000000e-01 : f32
    %156 = vector.broadcast %cst_74 : f32 to vector<8x64xf32>
    %157 = arith.mulf %156, %155 : vector<8x64xf32>
    %cst_75 = arith.constant 0.707106769 : f32
    %158 = vector.broadcast %cst_75 : f32 to vector<8x64xf32>
    %159 = arith.mulf %155, %158 : vector<8x64xf32>
    %cst_76 = arith.constant 0.000000e+00 : f32
    %160 = vector.broadcast %cst_76 : f32 to vector<8x64xf32>
    %161 = arith.cmpf oge, %159, %160 : vector<8x64xf32>
    %cst_77 = arith.constant 1.000000e+00 : f32
    %cst_78 = arith.constant -1.000000e+00 : f32
    %162 = vector.broadcast %cst_77 : f32 to vector<8x64xf32>
    %163 = vector.broadcast %cst_78 : f32 to vector<8x64xf32>
    %164 = arith.select %161, %162, %163 : vector<8x64xi1>, vector<8x64xf32>
    %165 = math.absf %159 : vector<8x64xf32>
    %cst_79 = arith.constant 0.327591091 : f32
    %166 = vector.broadcast %cst_79 : f32 to vector<8x64xf32>
    %167 = arith.mulf %166, %165 : vector<8x64xf32>
    %cst_80 = arith.constant 1.000000e+00 : f32
    %168 = vector.broadcast %cst_80 : f32 to vector<8x64xf32>
    %169 = arith.addf %168, %167 : vector<8x64xf32>
    %cst_81 = arith.constant 1.000000e+00 : f32
    %170 = vector.broadcast %cst_81 : f32 to vector<8x64xf32>
    %171 = arith.divf %170, %169 : vector<8x64xf32>
    %cst_82 = arith.constant 1.06140542 : f32
    %172 = vector.broadcast %cst_82 : f32 to vector<8x64xf32>
    %173 = arith.mulf %172, %171 : vector<8x64xf32>
    %cst_83 = arith.constant -1.45315206 : f32
    %174 = vector.broadcast %cst_83 : f32 to vector<8x64xf32>
    %175 = arith.addf %173, %174 : vector<8x64xf32>
    %176 = arith.mulf %175, %171 : vector<8x64xf32>
    %cst_84 = arith.constant 1.42141378 : f32
    %177 = vector.broadcast %cst_84 : f32 to vector<8x64xf32>
    %178 = arith.addf %176, %177 : vector<8x64xf32>
    %179 = arith.mulf %178, %171 : vector<8x64xf32>
    %cst_85 = arith.constant -0.284496725 : f32
    %180 = vector.broadcast %cst_85 : f32 to vector<8x64xf32>
    %181 = arith.addf %179, %180 : vector<8x64xf32>
    %182 = arith.mulf %181, %171 : vector<8x64xf32>
    %cst_86 = arith.constant 0.254829586 : f32
    %183 = vector.broadcast %cst_86 : f32 to vector<8x64xf32>
    %184 = arith.addf %182, %183 : vector<8x64xf32>
    %185 = arith.mulf %184, %171 : vector<8x64xf32>
    %cst_87 = arith.constant 0.000000e+00 : f32
    %186 = vector.broadcast %cst_87 : f32 to vector<8x64xf32>
    %187 = arith.subf %186, %165 : vector<8x64xf32>
    %188 = arith.mulf %187, %165 : vector<8x64xf32>
    %189 = math.exp %188 : vector<8x64xf32>
    %190 = arith.mulf %185, %189 : vector<8x64xf32>
    %cst_88 = arith.constant 1.000000e+00 : f32
    %191 = vector.broadcast %cst_88 : f32 to vector<8x64xf32>
    %192 = arith.subf %191, %190 : vector<8x64xf32>
    %193 = arith.mulf %164, %192 : vector<8x64xf32>
    %cst_89 = arith.constant 1.000000e+00 : f32
    %194 = vector.broadcast %cst_89 : f32 to vector<8x64xf32>
    %195 = arith.addf %194, %193 : vector<8x64xf32>
    %196 = arith.mulf %157, %195 : vector<8x64xf32>
    %c0_90 = arith.constant 0 : index
    %c0_91 = arith.constant 0 : index
    %197 = vector.load %arg16[%c0_90, %c0_91] : memref<64x64xf32, #tpu.memory_space<vmem>>, vector<64x64xf32>
    %cst_92 = arith.constant dense<0.000000e+00> : vector<8x64xf32>
    %198 = tpu.matmul %196, %197, %cst_92 {dimension_numbers = #tpu.dot_dimension_numbers<[1], [0], [0], [1], [0, 0, 1, 1], [], []>} : vector<8x64xf32>, vector<64x64xf32>, vector<8x64xf32> -> vector<8x64xf32>
    %c0_93 = arith.constant 0 : index
    %c0_94 = arith.constant 0 : index
    %199 = vector.load %arg17[%c0_93, %c0_94] : memref<1x64xf32, #tpu.memory_space<vmem>>, vector<1x64xf32>
    %200 = vector.broadcast %199 : vector<1x64xf32> to vector<8x64xf32>
    %201 = arith.addf %198, %200 : vector<8x64xf32>
    %c0_95 = arith.constant 0 : index
    %c0_96 = arith.constant 0 : index
    %202 = vector.load %arg18[%c0_95, %c0_96] : memref<1x64xf32, #tpu.memory_space<vmem>>, vector<1x64xf32>
    %c0_97 = arith.constant 0 : index
    %c0_98 = arith.constant 0 : index
    %203 = vector.load %arg19[%c0_97, %c0_98] : memref<1x64xf32, #tpu.memory_space<vmem>>, vector<1x64xf32>
    %cst_99 = arith.constant dense<0.000000e+00> : vector<8xf32>
    %204 = vector.multi_reduction <add>, %201, %cst_99 [1] : vector<8x64xf32> to vector<8xf32>
    %205 = vector.shape_cast %204 : vector<8xf32> to vector<8x1xf32>
    %cst_100 = arith.constant 6.400000e+01 : f32
    %206 = vector.broadcast %cst_100 : f32 to vector<8x1xf32>
    %207 = arith.divf %205, %206 : vector<8x1xf32>
    %208 = vector.broadcast %207 : vector<8x1xf32> to vector<8x64xf32>
    %209 = arith.subf %201, %208 : vector<8x64xf32>
    %210 = arith.mulf %209, %209 : vector<8x64xf32>
    %cst_101 = arith.constant dense<0.000000e+00> : vector<8xf32>
    %211 = vector.multi_reduction <add>, %210, %cst_101 [1] : vector<8x64xf32> to vector<8xf32>
    %212 = vector.shape_cast %211 : vector<8xf32> to vector<8x1xf32>
    %cst_102 = arith.constant 6.400000e+01 : f32
    %213 = vector.broadcast %cst_102 : f32 to vector<8x1xf32>
    %214 = arith.divf %212, %213 : vector<8x1xf32>
    %cst_103 = arith.constant 9.99999974E-6 : f32
    %215 = vector.broadcast %cst_103 : f32 to vector<8x1xf32>
    %216 = arith.addf %214, %215 : vector<8x1xf32>
    %217 = math.rsqrt %216 : vector<8x1xf32>
    %218 = vector.broadcast %217 : vector<8x1xf32> to vector<8x64xf32>
    %219 = arith.mulf %209, %218 : vector<8x64xf32>
    %220 = vector.broadcast %202 : vector<1x64xf32> to vector<8x64xf32>
    %221 = arith.mulf %219, %220 : vector<8x64xf32>
    %222 = vector.broadcast %203 : vector<1x64xf32> to vector<8x64xf32>
    %223 = arith.addf %221, %222 : vector<8x64xf32>
    %cst_104 = arith.constant 5.000000e-01 : f32
    %224 = vector.broadcast %cst_104 : f32 to vector<8x64xf32>
    %225 = arith.mulf %224, %223 : vector<8x64xf32>
    %cst_105 = arith.constant 0.707106769 : f32
    %226 = vector.broadcast %cst_105 : f32 to vector<8x64xf32>
    %227 = arith.mulf %223, %226 : vector<8x64xf32>
    %cst_106 = arith.constant 0.000000e+00 : f32
    %228 = vector.broadcast %cst_106 : f32 to vector<8x64xf32>
    %229 = arith.cmpf oge, %227, %228 : vector<8x64xf32>
    %cst_107 = arith.constant 1.000000e+00 : f32
    %cst_108 = arith.constant -1.000000e+00 : f32
    %230 = vector.broadcast %cst_107 : f32 to vector<8x64xf32>
    %231 = vector.broadcast %cst_108 : f32 to vector<8x64xf32>
    %232 = arith.select %229, %230, %231 : vector<8x64xi1>, vector<8x64xf32>
    %233 = math.absf %227 : vector<8x64xf32>
    %cst_109 = arith.constant 0.327591091 : f32
    %234 = vector.broadcast %cst_109 : f32 to vector<8x64xf32>
    %235 = arith.mulf %234, %233 : vector<8x64xf32>
    %cst_110 = arith.constant 1.000000e+00 : f32
    %236 = vector.broadcast %cst_110 : f32 to vector<8x64xf32>
    %237 = arith.addf %236, %235 : vector<8x64xf32>
    %cst_111 = arith.constant 1.000000e+00 : f32
    %238 = vector.broadcast %cst_111 : f32 to vector<8x64xf32>
    %239 = arith.divf %238, %237 : vector<8x64xf32>
    %cst_112 = arith.constant 1.06140542 : f32
    %240 = vector.broadcast %cst_112 : f32 to vector<8x64xf32>
    %241 = arith.mulf %240, %239 : vector<8x64xf32>
    %cst_113 = arith.constant -1.45315206 : f32
    %242 = vector.broadcast %cst_113 : f32 to vector<8x64xf32>
    %243 = arith.addf %241, %242 : vector<8x64xf32>
    %244 = arith.mulf %243, %239 : vector<8x64xf32>
    %cst_114 = arith.constant 1.42141378 : f32
    %245 = vector.broadcast %cst_114 : f32 to vector<8x64xf32>
    %246 = arith.addf %244, %245 : vector<8x64xf32>
    %247 = arith.mulf %246, %239 : vector<8x64xf32>
    %cst_115 = arith.constant -0.284496725 : f32
    %248 = vector.broadcast %cst_115 : f32 to vector<8x64xf32>
    %249 = arith.addf %247, %248 : vector<8x64xf32>
    %250 = arith.mulf %249, %239 : vector<8x64xf32>
    %cst_116 = arith.constant 0.254829586 : f32
    %251 = vector.broadcast %cst_116 : f32 to vector<8x64xf32>
    %252 = arith.addf %250, %251 : vector<8x64xf32>
    %253 = arith.mulf %252, %239 : vector<8x64xf32>
    %cst_117 = arith.constant 0.000000e+00 : f32
    %254 = vector.broadcast %cst_117 : f32 to vector<8x64xf32>
    %255 = arith.subf %254, %233 : vector<8x64xf32>
    %256 = arith.mulf %255, %233 : vector<8x64xf32>
    %257 = math.exp %256 : vector<8x64xf32>
    %258 = arith.mulf %253, %257 : vector<8x64xf32>
    %cst_118 = arith.constant 1.000000e+00 : f32
    %259 = vector.broadcast %cst_118 : f32 to vector<8x64xf32>
    %260 = arith.subf %259, %258 : vector<8x64xf32>
    %261 = arith.mulf %232, %260 : vector<8x64xf32>
    %cst_119 = arith.constant 1.000000e+00 : f32
    %262 = vector.broadcast %cst_119 : f32 to vector<8x64xf32>
    %263 = arith.addf %262, %261 : vector<8x64xf32>
    %264 = arith.mulf %225, %263 : vector<8x64xf32>
    %c0_120 = arith.constant 0 : index
    %c0_121 = arith.constant 0 : index
    %265 = vector.load %arg20[%c0_120, %c0_121] : memref<64x32xf32, #tpu.memory_space<vmem>>, vector<64x32xf32>
    %cst_122 = arith.constant dense<0.000000e+00> : vector<8x32xf32>
    %266 = tpu.matmul %264, %265, %cst_122 {dimension_numbers = #tpu.dot_dimension_numbers<[1], [0], [0], [1], [0, 0, 1, 1], [], []>} : vector<8x64xf32>, vector<64x32xf32>, vector<8x32xf32> -> vector<8x32xf32>
    %c0_123 = arith.constant 0 : index
    %c0_124 = arith.constant 0 : index
    %267 = vector.load %arg21[%c0_123, %c0_124] : memref<1x32xf32, #tpu.memory_space<vmem>>, vector<1x32xf32>
    %268 = vector.broadcast %267 : vector<1x32xf32> to vector<8x32xf32>
    %269 = arith.addf %266, %268 : vector<8x32xf32>
    %c0_125 = arith.constant 0 : index
    %c0_126 = arith.constant 0 : index
    %270 = vector.load %arg22[%c0_125, %c0_126] : memref<1x32xf32, #tpu.memory_space<vmem>>, vector<1x32xf32>
    %c0_127 = arith.constant 0 : index
    %c0_128 = arith.constant 0 : index
    %271 = vector.load %arg23[%c0_127, %c0_128] : memref<1x32xf32, #tpu.memory_space<vmem>>, vector<1x32xf32>
    %cst_129 = arith.constant dense<0.000000e+00> : vector<8xf32>
    %272 = vector.multi_reduction <add>, %269, %cst_129 [1] : vector<8x32xf32> to vector<8xf32>
    %273 = vector.shape_cast %272 : vector<8xf32> to vector<8x1xf32>
    %cst_130 = arith.constant 3.200000e+01 : f32
    %274 = vector.broadcast %cst_130 : f32 to vector<8x1xf32>
    %275 = arith.divf %273, %274 : vector<8x1xf32>
    %276 = vector.broadcast %275 : vector<8x1xf32> to vector<8x32xf32>
    %277 = arith.subf %269, %276 : vector<8x32xf32>
    %278 = arith.mulf %277, %277 : vector<8x32xf32>
    %cst_131 = arith.constant dense<0.000000e+00> : vector<8xf32>
    %279 = vector.multi_reduction <add>, %278, %cst_131 [1] : vector<8x32xf32> to vector<8xf32>
    %280 = vector.shape_cast %279 : vector<8xf32> to vector<8x1xf32>
    %cst_132 = arith.constant 3.200000e+01 : f32
    %281 = vector.broadcast %cst_132 : f32 to vector<8x1xf32>
    %282 = arith.divf %280, %281 : vector<8x1xf32>
    %cst_133 = arith.constant 9.99999974E-6 : f32
    %283 = vector.broadcast %cst_133 : f32 to vector<8x1xf32>
    %284 = arith.addf %282, %283 : vector<8x1xf32>
    %285 = math.rsqrt %284 : vector<8x1xf32>
    %286 = vector.broadcast %285 : vector<8x1xf32> to vector<8x32xf32>
    %287 = arith.mulf %277, %286 : vector<8x32xf32>
    %288 = vector.broadcast %270 : vector<1x32xf32> to vector<8x32xf32>
    %289 = arith.mulf %287, %288 : vector<8x32xf32>
    %290 = vector.broadcast %271 : vector<1x32xf32> to vector<8x32xf32>
    %291 = arith.addf %289, %290 : vector<8x32xf32>
    %292 = math.tanh %291 : vector<8x32xf32>
    %c0_134 = arith.constant 0 : index
    %c0_135 = arith.constant 0 : index
    %293 = vector.load %arg24[%c0_134, %c0_135] : memref<8x64xf32, #tpu.memory_space<vmem>>, vector<8x32xf32>
    tpu.vector_store %arg24[%c0_134, %c0_135], %292 {strides = array<i32>} : memref<8x64xf32, #tpu.memory_space<vmem>>, vector<8x32xf32>,
    %c0_136 = arith.constant 0 : index
    %c32_137 = arith.constant 32 : index
    %294 = vector.load %arg24[%c0_136, %c32_137] : memref<8x64xf32, #tpu.memory_space<vmem>>, vector<8x32xf32>
    tpu.vector_store %arg24[%c0_136, %c32_137], %32 {strides = array<i32>} : memref<8x64xf32, #tpu.memory_space<vmem>>, vector<8x32xf32>,
    return
  }
}

</mosaic_0001>

<bundles_post_ra>
// kernel: schrodinger_bridge_flow_forward.4
= control target key start
LH: loop header
LB: loop body
LE: loop exit
PB: predicated region body
PF: predicated region fallthrough
CT: control target
= control target key end

     0   :  { %vm13_vm0 = vcmask 261120   ;;  %v186_v5 = vmov 1.0   ;;  %v178_v15 = vmov 0.0   ;;  %s224_s1 = inlined_call_operand.vmem [shape: f32[8,32], index: 1, kind: input, shape index: {}]   ;;  %s225_s2 = inlined_call_operand.vmem [shape: f32[8,8], index: 2, kind: output, shape index: {}]   ;;  %s226_s0 = inlined_call_operand.vmem [shape: f32[8,32], index: 0, kind: input, shape index: {}]  }
   0x1   :  { %v12_v0 = vld [vmem:[%s224_s1] sm:$0xff] }
   0x2   :  { %v11_v1 = vld [vmem:[%s226_s0] sm:$0xff]  ;;  %v44_v2 = vmul.f32 %v12_v0, %v12_v0  ;;  %141 = vmatpush.xpose.msk.msra.mxu0 %vm13_vm0, %v12_v0  ;;  %s208_s0 = smov 0  }
   0x3   :  { %v40_v3 = vmul.f32 %v11_v1, %v11_v1 }
   0x4   :  { %143 = vmatpush.xpose.msk.msra.mxu1 %vm13_vm0, %v44_v2 }
   0x5   :  { %v41_v4 = vsel %vm13_vm0, %v40_v3, 0.0  ;;  %142 = vmatmul.msk.f32.vlgmr.msra.gmra.mxu0 %vm13_vm0, %v11_v1 }
   0x6   :  { %42 = vadd.xlane.f32.xlu0 %v41_v4 }
   0x7   :  { %144 = vmatmul.msk.f32.vlgmr.msra.gmra.mxu1 %vm13_vm0, %v186_v5 }
  0x79   :  { %v43_v8 = vpop.xlane.xlu0 %42 }
  0x82   :  { %v37_v6 = vpop.f32.mrf.mxu0 }
  0x83   :  { %v73_v10 = vmul.f32 2.0, %v37_v6 }
  0x84   :  { %v68_v7 = vpop.f32.mrf.mxu1 }
  0x85   :  { %v71_v9 = vperm.slane %v68_v7, 0 }
  0x87   :  { %v72_v11 = vadd.f32 %v71_v9, %v43_v8 }
  0x89   :  { %v74_v12 = vsub.f32 %v72_v11, %v73_v10 }
  0x8b   :  { %v75_v13 = vmax.f32 %v74_v12, 0.0 }
  0x8d   :  { %v76_v14 = vmul.f32 -12.5, %v75_v13 }
  0x8e LB: > { %vm86_vm1 = vcmask 64512   ;;  %s82_s0 = sadd.s32 1, %s184_s0   ;;  %s184_s0 = sphi %s208_s0, %s82_s0   ;;  %v180_v15 = vphi %v178_v15, %v179_v15  }
  0x8f   : > { %v85_v16 = vadd.f32 %v180_v15, %v76_v14  ;;  %p79_p0 = scmp.ge.s32.totalorder %s82_s0, 200  }
  0x91   : > { %v87_v17 = vsel %vm86_vm1, %v85_v16, -inf }
  0x92   : > { %88 = vmax.xlane.f32.xlu0 %v87_v17 }
 0x105   : > { %v89_v18 = vpop.xlane.xlu0 %88 }
 0x106   : > { %v90_v19 = vsub.f32 %v85_v16, %v89_v18 }
 0x108   : > { %v91_v20 = vmul.f32 1.442695, %v90_v19 }
 0x10a   : > { %162 = vpow2.f32 %v91_v20 }
 0x110   : > { %v163_v21 = vpop.eup %162 }
 0x111   : > { %v93_v22 = vsel %vm86_vm1, %v163_v21, 0.0 }
 0x112   : > { %94 = vadd.xlane.f32.xlu0 %v93_v22 }
 0x185   : > { %v95_v23 = vpop.xlane.xlu0 %94 }
 0x186   : > { %164 = vlog2.f32 %v95_v23 }
 0x18c   : > { %v165_v24 = vpop.eup %164 }
 0x18d   : > { %v97_v25 = vmul.f32 0.6931472, %v165_v24 }
 0x18f   : > { %v98_v26 = vadd.f32 %v97_v25, %v89_v18 }
 0x191   : > { %v99_v27 = vsub.f32 -2.0794415, %v98_v26 }
 0x193   : > { %v100_v28 = vadd.f32 %v99_v27, %v76_v14 }
 0x195   : > { %v101_v29 = vsel %vm86_vm1, %v100_v28, -inf }
 0x196   : > { %v102_v30 = vrot.slane %v101_v29, 4 }
 0x198   : > { %v103_v31 = vmax.f32 %v101_v29, %v102_v30 }
 0x19a   : > { %v104_v32 = vrot.slane %v103_v31, 2 }
 0x19c   : > { %v105_v33 = vmax.f32 %v103_v31, %v104_v32 }
 0x19e   : > { %v106_v34 = vrot.slane %v105_v33, 1 }
 0x1a0   : > { %v107_v35 = vmax.f32 %v105_v33, %v106_v34 }
 0x1a2   : > { %v108_v36 = vsub.f32 %v100_v28, %v107_v35 }
 0x1a4   : > { %v109_v37 = vmul.f32 1.442695, %v108_v36 }
 0x1a6   : > { %166 = vpow2.f32 %v109_v37 }
 0x1ac   : > { %v167_v38 = vpop.eup %166 }
 0x1ad   : > { %v111_v39 = vsel %vm86_vm1, %v167_v38, 0.0 }
 0x1ae   : > { %v112_v40 = vrot.slane %v111_v39, 4 }
 0x1b0   : > { %v113_v41 = vadd.f32 %v112_v40, %v111_v39 }
 0x1b2   : > { %v114_v42 = vrot.slane %v113_v41, 2 }
 0x1b4   : > { %v115_v43 = vadd.f32 %v114_v42, %v113_v41 }
 0x1b6   : > { %v116_v44 = vrot.slane %v115_v43, 1 }
 0x1b8   : > { %v117_v45 = vadd.f32 %v116_v44, %v115_v43 }
 0x1ba   : > { %168 = vlog2.f32 %v117_v45 }
 0x1c0   : > { %v169_v46 = vpop.eup %168 }
 0x1c1   : > { %v119_v47 = vmul.f32 0.6931472, %v169_v46 }
 0x1c3   : > { %v120_v48 = vadd.f32 %v119_v47, %v107_v35  ;;  %81 = sbr.rel (!%p79_p0) target bundleno = 142 (0x8e), region = 35 }
 0x1c5   : > { %v121_v49 = vsub.f32 -2.0794415, %v120_v48  }
 0x1c7   : > { %v179_v15 = vmov %v121_v49   ;;  %v123_v50 = vadd.f32 (%p79_p0), %v121_v49, %v100_v28 }
 0x1c9   :  { %125 = vst.msk [vmem:[%s225_s2] sm:$0xff] %vm86_vm1, %v123_v50 }

// kernel: schrodinger_bridge_flow_forward.5
= control target key start
LH: loop header
LB: loop body
LE: loop exit
PB: predicated region body
PF: predicated region fallthrough
CT: control target
= control target key end

     0   :  { %v709_v0 = vmov 0   ;;  %v77_v4 = vlaneseq  ;;  %vm94_vm0 = vcmask 64512   ;;  %v710_v7 = vmov 0.0   ;;  %s1052_s4 = inlined_call_operand.vmem [shape: f32[8,1], index: 4, kind: input, shape index: {}]   ;;  %s1053_s1 = inlined_call_operand.vmem [shape: s32[8,1], index: 1, kind: input, shape index: {}]   ;;  %s1054_s6 = inlined_call_operand.vmem [shape: f32[1,32], index: 6, kind: input, shape index: {}]   ;;  %s1055_s7 = inlined_call_operand.vmem [shape: f32[1,32], index: 7, kind: input, shape index: {}]   ;;  %s1056_s3 = inlined_call_operand.vmem [shape: f32[8,32], index: 3, kind: input, shape index: {}]   ;;  %s1057_s8 = inlined_call_operand.vmem [shape: f32[1,32], index: 8, kind: input, shape index: {}]   ;;  %s1058_s9 = inlined_call_operand.vmem [shape: f32[1,32], index: 9, kind: input, shape index: {}]   ;;  %s1059_s0 = inlined_call_operand.vmem [shape: s32[8,1], index: 0, kind: input, shape index: {}]   ;;  %s1060_s2 = inlined_call_operand.vmem [shape: f32[8,32], index: 2, kind: input, shape index: {}]   ;;  %s1061_s10 = inlined_call_operand.vmem [shape: f32[32,32], index: 10, kind: input, shape index: {}]   ;;  %s1062_s11 = inlined_call_operand.vmem [shape: f32[1,32], index: 11, kind: input, shape index: {}]   ;;  %s1063_s5 = inlined_call_operand.vmem [shape: f32[8,32], index: 5, kind: input, shape index: {}]   ;;  %s1064_s13 = inlined_call_operand.vmem [shape: f32[1,64], index: 13, kind: input, shape index: {}]   ;;  %s1065_s12 = inlined_call_operand.vmem [shape: f32[96,64], index: 12, kind: input, shape index: {}]   ;;  %s1066_s14 = inlined_call_operand.vmem [shape: f32[1,64], index: 14, kind: input, shape index: {}]   ;;  %s1067_s15 = inlined_call_operand.vmem [shape: f32[1,64], index: 15, kind: input, shape index: {}]   ;;  %s1068_s17 = inlined_call_operand.vmem [shape: f32[1,64], index: 17, kind: input, shape index: {}]   ;;  %s1069_s16 = inlined_call_operand.vmem [shape: f32[64,64], index: 16, kind: input, shape index: {}]   ;;  %s1070_s18 = inlined_call_operand.vmem [shape: f32[1,64], index: 18, kind: input, shape index: {}]   ;;  %s1071_s19 = inlined_call_operand.vmem [shape: f32[1,64], index: 19, kind: input, shape index: {}]   ;;  %s1072_s21 = inlined_call_operand.vmem [shape: f32[1,32], index: 21, kind: input, shape index: {}]   ;;  %s1073_s20 = inlined_call_operand.vmem [shape: f32[64,32], index: 20, kind: input, shape index: {}]   ;;  %s1074_s22 = inlined_call_operand.vmem [shape: f32[1,32], index: 22, kind: input, shape index: {}]   ;;  %s1075_s23 = inlined_call_operand.vmem [shape: f32[1,32], index: 23, kind: input, shape index: {}]   ;;  %s1076_s24 = inlined_call_operand.vmem [shape: f32[8,64], index: 24, kind: output, shape index: {}]  }
   0x1   :  { %1077 = sst [smem:[#allocation3_spill]] %s1052_s4  ;;  %664 = vset.pattern.permute.xlu2 %v709_v0  ;;  %662 = vset.pattern.permute.xlu0 %v709_v0  ;;  %vm219_vm2 = vcmask 261120   ;;  %v711_v15 = vmov 32.0   ;;  %v300_v57 = vld [vmem:[%s1061_s10 + $0x18] sm:$0xff]  ;;  %v299_v58 = vld [vmem:[%s1061_s10 + $0x10] sm:$0xff]  ;;  %v298_v59 = vld [vmem:[%s1061_s10 + $0x8] sm:$0xff] }
   0x2   :  { %1078 = sst [smem:[#allocation4_spill]] %s1053_s1  ;;  %663 = vset.pattern.permute.xlu1 %v709_v0  ;;  %v850_v5 = vand.u32 127, %v77_v4  ;;  %679 = vrcp.f32 %v711_v15  ;;  %320 = vmatpush.msra.mxu2 %v300_v57  ;;  %v297_v60 = vld [vmem:[%s1061_s10] sm:$0xff] }
   0x3   :  { %1079 = sst [smem:[#allocation5_spill]] %s1054_s6 }
   0x4   :  { %1080 = sst [smem:[#allocation6_spill]] %s1055_s7  ;;  %321 = vmatpush.msra.mxu2 %v299_v58 }
   0x5   :  { %1081 = sst [smem:[#allocation7_spill]] %s1056_s3 }
   0x6   :  { %1082 = sst [smem:[#allocation8_spill]] %s1057_s8  ;;  %322 = vmatpush.msra.mxu2 %v298_v59 }
   0x7   :  { %1083 = sst [smem:[#allocation9_spill]] %s1058_s9 }
   0x8   :  { %1084 = sst [smem:[#allocation10_spill]] %s1059_s0  ;;  %v680_v16 = vpop.eup %679  ;;  %323 = vmatpush.msra.mxu2 %v297_v60  ;;  %s713_s0 = smov 32  }
   0x9   :  { %1085 = sst [smem:[#allocation11_spill]] %s1060_s2  ;;  %v224_v17 = vmul.f32 32.0, %v680_v16  ;;  %vm228_vm3 = vweird.f32 %v680_v16 }
   0xa   :  { %s1086_s27 = sld [smem:[#allocation3_spill]] }
   0xb   :  { %s1087_s6 = sld [smem:[#allocation4_spill]]  ;;  %v225_v18 = vsub.f32 1.0, %v224_v17 }
   0xc   :  { %s1088_s4 = sld [smem:[#allocation7_spill]] }
   0xd   :  { %s1089_s7 = sld [smem:[#allocation5_spill]]  ;;  %v226_v19 = vmul.f32 %v680_v16, %v225_v18 }
   0xe   :  { %s1090_s1 = sld [smem:[#allocation6_spill]] }
   0xf   :  { %v227_v20 = vadd.f32 %v680_v16, %v226_v19  ;;  %s1093_s26 = sld [smem:[#allocation8_spill]] }
  0x10   :  { %v142_v1 = vld [vmem:[%s1086_s27] sm:$0xff]  ;;  %s1091_s27 = sld [smem:[#allocation10_spill]] }
  0x11   :  { %v86_v2 = vld [vmem:[%s1087_s6] sm:$0xff]  ;;  %146 = vperm.xlu0 %662, %v142_v1   ;;  %v865_v21 = vsel %vm228_vm3, %v680_v16, %v227_v20  ;;  %v150_v24 = vsub.f32 1.0, %v142_v1  ;;  %v179_v30 = vmul.f32 2.0, %v142_v1  ;;  %s1092_s6 = sld [smem:[#allocation11_spill]] }
  0x12   :  { %88 = vperm.xlu2 %664, %v86_v2   ;;  %v118_v3 = vld [vmem:[%s1088_s4] sm:$0xff]  ;;  %s1094_s28 = sld [smem:[#allocation9_spill]] }
  0x13   :  { %137 = vmatpush.msra.mxu1 %v118_v3  ;;  %v665_v9 = vld [vmem:[%s1089_s7] ss:$0 sm:$0xff]  ;;  %v158_v29 = vmul.f32 %v150_v24, %v142_v1  ;;  %v181_v31 = vmul.f32 %v179_v30, %v150_v24  ;;  %v180_v52 = vsub.f32 1.0, %v179_v30 }
  0x14   :  { %v666_v10 = vld [vmem:[%s1090_s1] ss:$0 sm:$0xff] }
  0x15   :  { %681 = vrsqrt.f32 %v158_v29  ;;  %v182_v33 = vadd.f32 1e-08, %v181_v31  ;;  %vm166_vm4 = vcmp.eq.f32.partialorder %v158_v29, inf  ;;  %v169_v41 = vand.u32 2147483648, %v158_v29 }
  0x16   :  { %v79_v28 = vld [vmem:[%s1091_s27] sm:$0xff]  ;;  %vm168_vm5 = vcmp.eq.f32.partialorder %v158_v29, 0.0 }
  0x17   :  { %683 = vrcp.f32 %v182_v33  ;;  %v194_v48 = vand.u32 2147483648, %v182_v33  ;;  %vm188_vm6 = vweird.f32 %v182_v33  ;;  %v192_v50 = vand.u32 2147483647, %v182_v33  ;;  %v93_v56 = vld [vmem:[%s1092_s6] sm:$0xff] }
  0x18   :  { %113 = vmatpush.msra.mxu0 %v93_v56 }
  0x19   :  { %v195_v51 = vor.u32 1.1754944e-38, %v194_v48  ;;  %vm193_vm9 = vcmp.eq.f32.partialorder %v192_v50, 8.507059e+37 }
  0x1a   :  { %153 = vperm.xlu2 %664, %v150_v24  }
  0x1b   :  { %v682_v32 = vpop.eup %681 }
  0x1c   :  { %v160_v34 = vmul.f32 %v682_v32, %v158_v29 }
  0x1d   :  { %v684_v39 = vpop.eup %683 }
  0x1e   :  { %v161_v35 = vmul.f32 %v682_v32, %v160_v34  ;;  %v184_v43 = vmul.f32 %v684_v39, %v182_v33  ;;  %vm189_vm7 = vweird.f32 %v684_v39 }
  0x1f   :  { %vm190_vm8 = vmor %vm188_vm6, %vm189_vm7  ;;  %vm358_vm6 = vcmask 785408   ;;  %vm384_vm7 = vcmask 523264  }
  0x20   :  { %v162_v36 = vmul.f32 0.5, %v161_v35  ;;  %v185_v46 = vsub.f32 1.0, %v184_v43 }
  0x22   :  { %v163_v37 = vsub.f32 1.5, %v162_v36  ;;  %v186_v47 = vmul.f32 %v684_v39, %v185_v46 }
  0x24   :  { %v164_v38 = vmul.f32 %v682_v32, %v163_v37  ;;  %v187_v49 = vadd.f32 %v684_v39, %v186_v47 }
  0x26   :  { %v165_v40 = vmul.f32 %v164_v38, %v158_v29  ;;  %v191_v53 = vsel %vm190_vm8, %v684_v39, %v187_v49 }
  0x27   :  { %v196_v54 = vsel %vm193_vm9, %v195_v51, %v191_v53 }
  0x28   :  { %v167_v42 = vsel %vm166_vm4, %v158_v29, %v165_v40  ;;  %v197_v55 = vmul.f32 %v196_v54, %v180_v52  ;;  %v143_v54 = vld [vmem:[%s1063_s5] sm:$0xff]  ;;  %s714_s5 = smov 64   ;;  %vm333_vm4 = vcmask 523520  }
  0x29   :  { %v170_v44 = vsel %vm168_vm5, %v169_v41, %v167_v42  ;;  %vm339_vm5 = vcmask 785920  }
  0x2a   :  { %v171_v45 = vmul.f32 0.2, %v170_v44 }
  0x2c   :  { %174 = vperm.xlu2 %664, %v171_v45   ;;  %v712_v45 = vmov -1.0  }
  0x34   :  { %201 = vperm.xlu2 %664, %v197_v55  }
  0x6c   :  { %v89_v6 = vpop.permute.xlu2 %88 }
  0x6d   :  { %vm90_vm1 = vcmp.eq.s32.totalorder %v850_v5, %v89_v6 }
  0x6e   :  { %v648_v8 = vsel %vm90_vm1, 1.0, %v710_v7 }
  0x6f   :  { %650 = vmatmul.msk.f32.vlgmr.msra.gmra.mxu1 %vm94_vm0, %v648_v8  ;;  %v667_v8 = vld [vmem:[%s1093_s26] ss:$0 sm:$0xff] }
  0x74   :  { %v154_v51 = vpop.permute.xlu2 %153 }
  0x83   :  { %v861_v11 = vpop.permute.xlu0 %146 }
  0x84   :  { %v211_v12 = vmul.f32 %v665_v9, %v861_v11 }
  0x86   :  { %v216_v13 = vadd.f32 %v666_v10, %v211_v12  ;;  %v668_v12 = vld [vmem:[%s1094_s28] ss:$0 sm:$0xff]  ;;  %v175_v53 = vpop.permute.xlu2 %174 }
  0x87   :  { %v177_v58 = vmul.f32 %v175_v53, %v143_v54 }
  0x88   :  { %v220_v14 = vsel %vm219_vm2, %v216_v13, 0.0 }
  0x89   :  { %221 = vadd.xlane.f32.xlu0 %v220_v14 }
  0xec   :  { %v139_v52 = vpop.f32.mrf.mxu1 }
  0xed   :  { %v149_v56 = vmul.f32 %v861_v11, %v139_v52 }
  0xfc   :  { %v222_v22 = vpop.xlane.xlu0 %221 }
  0xfd   :  { %v230_v23 = vmul.f32 %v865_v21, %v222_v22 }
  0xff   :  { %v868_v25 = vsub.f32 %v216_v13, %v230_v23 }
 0x101   :  { %v232_v26 = vmul.f32 %v868_v25, %v868_v25 }
 0x103   :  { %v233_v27 = vsel %vm219_vm2, %v232_v26, 0.0 }
 0x104   :  { %234 = vadd.xlane.f32.xlu1 %v233_v27 }
 0x11d   :  { %81 = vperm.xlu1 %663, %v79_v28  }
 0x177   :  { %v235_v61 = vpop.xlane.xlu1 %234 }
 0x178   :  { %v236_v62 = vmul.f32 %v235_v61, %v865_v21 }
 0x17a   :  { %v237_v63 = vadd.f32 1e-05, %v236_v62 }
 0x17c   :  { %685 = vrsqrt.f32 %v237_v63  ;;  %vm244_vm11 = vweird.f32 %v237_v63 }
 0x182   :  { %v686_v0 = vpop.eup %685 }
 0x183   :  { %v239_v1 = vmul.f32 %v686_v0, %v237_v63  ;;  %vm245_vm10 = vweird.f32 %v686_v0  ;;  %v202_v63 = vpop.permute.xlu2 %201 }
 0x184   :  { %vm246_vm12 = vmor %vm244_vm11, %vm245_vm10 }
 0x185   :  { %v240_v2 = vmul.f32 %v686_v0, %v239_v1 }
 0x187   :  { %v241_v3 = vmul.f32 0.5, %v240_v2  ;;  %v669_v2 = vld [vmem:[%s1062_s11] ss:$0 sm:$0xff] }
 0x189   :  { %v242_v4 = vsub.f32 1.5, %v241_v3 }
 0x18b   :  { %v243_v6 = vmul.f32 %v686_v0, %v242_v4  ;;  %v353_v4 = vld [vmem:[%s1065_s12 + $0x58] sm:$0xff] }
 0x18c   :  { %366 = vmatpush.msra.mxu3 %v353_v4 }
 0x18d   :  { %v247_v9 = vsel %vm246_vm12, %v686_v0, %v243_v6  ;;  %v352_v6 = vld [vmem:[%s1065_s12 + $0x50] sm:$0xff] }
 0x18e   :  { %v248_v10 = vmul.f32 %v247_v9, %v868_v25  ;;  %367 = vmatpush.msra.mxu3 %v352_v6  ;;  %v350_v9 = vld [vmem:[%s1065_s12 + $0x40] sm:$0xff] }
 0x18f   :  { %v82_v13 = vpop.permute.xlu1 %81 }
 0x190   :  { %vm83_vm13 = vcmp.eq.s32.totalorder %v850_v5, %v82_v13  ;;  %v252_v14 = vmul.f32 %v667_v8, %v248_v10  ;;  %v351_v8 = vld [vmem:[%s1065_s12 + $0x48] sm:$0xff]  ;;  %v349_v10 = vld [vmem:[%s1065_s12 + $0x38] sm:$0xff] }
 0x191   :  { %v647_v15 = vsel %vm83_vm13, 1.0, %v710_v7  ;;  %368 = vmatpush.msra.mxu3 %v351_v8  ;;  %v347_v13 = vld [vmem:[%s1065_s12 + $0x28] sm:$0xff] }
 0x192   :  { %649 = vmatmul.msk.f32.vlgmr.msra.gmra.mxu0 %vm94_vm0, %v647_v15  ;;  %v256_v16 = vadd.f32 %v668_v12, %v252_v14  ;;  %v348_v12 = vld [vmem:[%s1065_s12 + $0x30] sm:$0xff]  ;;  %v346_v14 = vld [vmem:[%s1065_s12 + $0x20] sm:$0xff] }
 0x193   :  { %369 = vmatpush.msra.mxu3 %v350_v9 }
 0x194   :  { %v258_v17 = vmul.f32 0.70710677, %v256_v16  ;;  %v257_v48 = vmul.f32 0.5, %v256_v16  ;;  %v345_v16 = vld [vmem:[%s1065_s12 + $0x18] sm:$0xff] }
 0x195   :  { %370 = vmatpush.msra.mxu3 %v349_v10 }
 0x196   :  { %v261_v18 = vand.u32 2147483647, %v258_v17  ;;  %vm259_vm0 = vcmp.ge.f32.partialorder %v258_v17, 0.0  ;;  %v344_v17 = vld [vmem:[%s1065_s12 + $0x10] sm:$0xff] }
 0x197   :  { %v260_v46 = vsel %vm259_vm0, 1.0, %v712_v45  ;;  %371 = vmatpush.msra.mxu3 %v348_v12 }
 0x198   :  { %v262_v19 = vmul.f32 0.3275911, %v261_v18  ;;  %v288_v30 = vsub.f32 0.0, %v261_v18 }
 0x199   :  { %372 = vmatpush.msra.mxu3 %v347_v13 }
 0x19a   :  { %v263_v20 = vadd.f32 1.0, %v262_v19  ;;  %v289_v33 = vmul.f32 %v288_v30, %v261_v18  ;;  %v343_v18 = vld [vmem:[%s1065_s12 + $0x8] sm:$0xff]  ;;  %v342_v19 = vld [vmem:[%s1065_s12] sm:$0xff] }
 0x19b   :  { %373 = vmatpush.msra.mxu3 %v346_v14 }
 0x19c   :  { %687 = vrcp.f32 %v263_v20  ;;  %v275_v25 = vand.u32 2147483648, %v263_v20  ;;  %v273_v27 = vand.u32 2147483647, %v263_v20  ;;  %vm269_vm15 = vweird.f32 %v263_v20 }
 0x19d   :  { %v290_v36 = vmul.f32 1.442695, %v289_v33  ;;  %374 = vmatpush.msra.mxu3 %v345_v16 }
 0x19e   :  { %v276_v5 = vor.u32 1.1754944e-38, %v275_v25  ;;  %vm274_vm3 = vcmp.eq.f32.partialorder %v273_v27, 8.507059e+37  ;;  %v715_v27 = vmov 64.0  }
 0x19f   :  { %689 = vpow2.f32 %v290_v36  ;;  %375 = vmatpush.msra.mxu3 %v344_v17 }
 0x1a0   :  { %691 = vrcp.f32 %v715_v27 }
 0x1a1   :  { %376 = vmatpush.msra.mxu3 %v343_v18 }
 0x1a2   :  { %v688_v22 = vpop.eup %687 }
 0x1a3   :  { %v265_v23 = vmul.f32 %v688_v22, %v263_v20  ;;  %vm270_vm14 = vweird.f32 %v688_v22  ;;  %377 = vmatpush.msra.mxu3 %v342_v19 }
 0x1a4   :  { %vm271_vm1 = vmor %vm269_vm15, %vm270_vm14 }
 0x1a5   :  { %v266_v24 = vsub.f32 1.0, %v265_v23  ;;  %v690_v42 = vpop.eup %689  ;;  %v670_v23 = vld [vmem:[%s1064_s13] ss:$0 sm:$0xff] }
 0x1a7   :  { %v267_v26 = vmul.f32 %v688_v22, %v266_v24 }
 0x1a9   :  { %v268_v28 = vadd.f32 %v688_v22, %v267_v26 }
 0x1ab   :  { %v272_v7 = vsel %vm271_vm1, %v688_v22, %v268_v28  ;;  %v692_v28 = vpop.eup %691 }
 0x1ac   :  { %v277_v29 = vsel %vm274_vm3, %v276_v5, %v272_v7  ;;  %v389_v5 = vmul.f32 64.0, %v692_v28  ;;  %vm393_vm8 = vweird.f32 %v692_v28 }
 0x1ad   :  { %v279_v31 = vmul.f32 1.0614054, %v277_v29 }
 0x1ae   :  { %v390_v7 = vsub.f32 1.0, %v389_v5 }
 0x1af   :  { %v280_v32 = vadd.f32 -1.4531521, %v279_v31 }
 0x1b1   :  { %v281_v34 = vmul.f32 %v280_v32, %v277_v29 }
 0x1b3   :  { %v282_v35 = vadd.f32 1.4214138, %v281_v34 }
 0x1b5   :  { %v283_v37 = vmul.f32 %v282_v35, %v277_v29 }
 0x1b7   :  { %v284_v38 = vadd.f32 -0.28449672, %v283_v37  ;;  %v469_v37 = vld [vmem:[%s1069_s16 + $0x38] sm:$0xff] }
 0x1b8   :  { %485 = vmatpush.msrb.mxu0 %v469_v37 }
 0x1b9   :  { %v285_v39 = vmul.f32 %v284_v38, %v277_v29  ;;  %v468_v38 = vld [vmem:[%s1069_s16 + $0x30] sm:$0xff] }
 0x1ba   :  { %486 = vmatpush.msrb.mxu0 %v468_v38 }
 0x1bb   :  { %v286_v40 = vadd.f32 0.2548296, %v285_v39  ;;  %v467_v39 = vld [vmem:[%s1069_s16 + $0x28] sm:$0xff] }
 0x1bc   :  { %487 = vmatpush.msrb.mxu0 %v467_v39 }
 0x1bd   :  { %v287_v41 = vmul.f32 %v286_v40, %v277_v29  ;;  %v391_v29 = vmul.f32 %v692_v28, %v390_v7  ;;  %v466_v40 = vld [vmem:[%s1069_s16 + $0x20] sm:$0xff] }
 0x1be   :  { %488 = vmatpush.msrb.mxu0 %v466_v40 }
 0x1bf   :  { %v292_v43 = vmul.f32 %v690_v42, %v287_v41  ;;  %v392_v30 = vadd.f32 %v692_v28, %v391_v29  ;;  %v465_v41 = vld [vmem:[%s1069_s16 + $0x18] sm:$0xff] }
 0x1c0   :  { %489 = vmatpush.msrb.mxu0 %v465_v41 }
 0x1c1   :  { %v293_v44 = vsub.f32 1.0, %v292_v43  ;;  %v955_v31 = vsel %vm393_vm8, %v692_v28, %v392_v30 }
 0x1c3   :  { %v294_v47 = vmul.f32 %v293_v44, %v260_v46  ;;  %v464_v44 = vld [vmem:[%s1069_s16 + $0x10] sm:$0xff] }
 0x1c4   :  { %490 = vmatpush.msrb.mxu0 %v464_v44  ;;  %v574_v44 = vld [vmem:[%s1073_s20 + $0x28] sm:$0xff] }
 0x1c5   :  { %v295_v49 = vadd.f32 1.0, %v294_v47  ;;  %v463_v47 = vld [vmem:[%s1069_s16 + $0x8] sm:$0xff] }
 0x1c6   :  { %491 = vmatpush.msrb.mxu0 %v463_v47  ;;  %v572_v47 = vld [vmem:[%s1073_s20 + $0x18] sm:$0xff] }
 0x1c7   :  { %v296_v50 = vmul.f32 %v295_v49, %v257_v48  ;;  %v462_v48 = vld [vmem:[%s1069_s16] sm:$0xff] }
 0x1c8   :  { %492 = vmatpush.msrb.mxu0 %v462_v48 }
 0x1c9   :  { %651 = vmatmul.msk.f32.vlgmr.msra.gmra.mxu2 %vm219_vm2, %v296_v50 }
 0x20f   :  { %v115_v55 = vpop.f32.mrf.mxu0 }
 0x210   :  { %v156_v57 = vmul.f32 %v154_v51, %v115_v55  ;;  %v205_v62 = vsub.f32 %v139_v52, %v115_v55  ;;  %v671_v55 = vld [vmem:[%s1066_s14] ss:$0 sm:$0xff] }
 0x212   :  { %v157_v59 = vadd.f32 %v156_v57, %v149_v56 }
 0x214   :  { %v178_v60 = vadd.f32 %v177_v58, %v157_v59  ;;  %v672_v58 = vld [vmem:[%s1067_s15] ss:$0 sm:$0xff] }
 0x216   :  { %v198_v61 = vsub.f32 %v178_v60, %v157_v59  ;;  %328 = vst.msk [vmem:[#allocation2] sm:$0xff] %vm219_vm2, %v178_v60 }
 0x218   :  { %v204_v0 = vmul.f32 %v202_v63, %v198_v61 }
 0x21a   :  { %v206_v1 = vadd.f32 %v205_v62, %v204_v0 }
 0x21c   :  { %330 = vrot.lane.b32.xlu2 %v206_v1, %s713_s0 }
 0x24c   :  { %v325_v3 = vpop.f32.mrf.mxu2 }
 0x24d   :  { %v326_v11 = vadd.f32 %v669_v2, %v325_v3 }
 0x24f   :  { %336 = vrot.lane.b32.xlu1 %v326_v11, %s714_s5 }
 0x276   :  { %v331_v15 = vpop.permute.xlu2 %330 }
 0x277   :  { %334 = vst.msk [vmem:[#allocation2] sm:$0xff] %vm333_vm4, %v331_v15 }
 0x2c1   :  { %v337_v20 = vpop.permute.xlu1 %336 }
 0x2c2   :  { %340 = vst.msk [vmem:[#allocation2] sm:$0xff] %vm339_vm5, %v337_v20 }
 0x2c9   :  { %v341_v22 = vld [vmem:[#allocation2] sm:$0xff] }
 0x2ca   :  { %652 = vmatmul.msk.f32.vlgmr.msra.gmra.mxu3 %vm358_vm6, %v341_v22 }
 0x34d   :  { %v379_v24 = vpop.f32.mrf.mxu3 }
 0x34e   :  { %v380_v25 = vadd.f32 %v670_v23, %v379_v24 }
 0x350   :  { %v385_v26 = vsel %vm384_vm7, %v380_v25, 0.0 }
 0x351   :  { %386 = vadd.xlane.f32.xlu2 %v385_v26 }
 0x369   :  { %639 = vrot.lane.b32.xlu2 %v178_v60, %s713_s0 }
 0x3c4   :  { %v387_v32 = vpop.xlane.xlu2 %386 }
 0x3c5   :  { %v395_v33 = vmul.f32 %v955_v31, %v387_v32 }
 0x3c7   :  { %v396_v34 = vsub.f32 %v380_v25, %v395_v33  ;;  %v673_v33 = vld [vmem:[%s1068_s17] ss:$0 sm:$0xff] }
 0x3c9   :  { %v397_v35 = vmul.f32 %v396_v34, %v396_v34 }
 0x3cb   :  { %v398_v36 = vsel %vm384_vm7, %v397_v35, 0.0 }
 0x3cc   :  { %399 = vadd.xlane.f32.xlu1 %v398_v36 }
 0x43f   :  { %v400_v42 = vpop.xlane.xlu1 %399 }
 0x440   :  { %v401_v43 = vmul.f32 %v400_v42, %v955_v31  ;;  %v576_v42 = vld [vmem:[%s1073_s20 + $0x38] sm:$0xff] }
 0x441   :  { %592 = vmatpush.msrb.mxu1 %v576_v42 }
 0x442   :  { %v402_v46 = vadd.f32 1e-05, %v401_v43  ;;  %v575_v43 = vld [vmem:[%s1073_s20 + $0x30] sm:$0xff] }
 0x443   :  { %593 = vmatpush.msrb.mxu1 %v575_v43 }
 0x444   :  { %693 = vrsqrt.f32 %v402_v46  ;;  %vm409_vm10 = vweird.f32 %v402_v46 }
 0x445   :  { %594 = vmatpush.msrb.mxu1 %v574_v44 }
 0x44a   :  { %v694_v49 = vpop.eup %693 }
 0x44b   :  { %v404_v50 = vmul.f32 %v694_v49, %v402_v46  ;;  %vm410_vm9 = vweird.f32 %v694_v49  ;;  %v573_v46 = vld [vmem:[%s1073_s20 + $0x20] sm:$0xff] }
 0x44c   :  { %vm411_vm11 = vmor %vm409_vm10, %vm410_vm9  ;;  %595 = vmatpush.msrb.mxu1 %v573_v46 }
 0x44d   :  { %v405_v51 = vmul.f32 %v694_v49, %v404_v50  ;;  %v571_v50 = vld [vmem:[%s1073_s20 + $0x10] sm:$0xff] }
 0x44e   :  { %596 = vmatpush.msrb.mxu1 %v572_v47 }
 0x44f   :  { %v406_v52 = vmul.f32 0.5, %v405_v51 }
 0x450   :  { %597 = vmatpush.msrb.mxu1 %v571_v50 }
 0x451   :  { %v407_v53 = vsub.f32 1.5, %v406_v52  ;;  %v570_v52 = vld [vmem:[%s1073_s20 + $0x8] sm:$0xff] }
 0x452   :  { %598 = vmatpush.msrb.mxu1 %v570_v52 }
 0x453   :  { %v408_v54 = vmul.f32 %v694_v49, %v407_v53  ;;  %v569_v53 = vld [vmem:[%s1073_s20] sm:$0xff] }
 0x454   :  { %599 = vmatpush.msrb.mxu1 %v569_v53 }
 0x455   :  { %v412_v56 = vsel %vm411_vm11, %v694_v49, %v408_v54 }
 0x456   :  { %v413_v57 = vmul.f32 %v412_v56, %v396_v34 }
 0x458   :  { %v417_v59 = vmul.f32 %v671_v55, %v413_v57 }
 0x45a   :  { %v421_v60 = vadd.f32 %v672_v58, %v417_v59  ;;  %v674_v59 = vld [vmem:[%s1070_s18] ss:$0 sm:$0xff] }
 0x45c   :  { %v423_v61 = vmul.f32 0.70710677, %v421_v60  ;;  %v422_v29 = vmul.f32 0.5, %v421_v60 }
 0x45e   :  { %v426_v62 = vand.u32 2147483647, %v423_v61  ;;  %vm424_vm1 = vcmp.ge.f32.partialorder %v423_v61, 0.0 }
 0x45f   :  { %v425_v5 = vsel %vm424_vm1, 1.0, %v712_v45 }
 0x460   :  { %v427_v63 = vmul.f32 0.3275911, %v426_v62  ;;  %v453_v13 = vsub.f32 0.0, %v426_v62 }
 0x462   :  { %v428_v0 = vadd.f32 1.0, %v427_v63  ;;  %v454_v16 = vmul.f32 %v453_v13, %v426_v62  ;;  %v675_v62 = vld [vmem:[%s1071_s19] ss:$0 sm:$0xff] }
 0x464   :  { %695 = vrcp.f32 %v428_v0  ;;  %v440_v11 = vand.u32 2147483648, %v428_v0  ;;  %v438_v6 = vand.u32 2147483647, %v428_v0  ;;  %vm434_vm13 = vweird.f32 %v428_v0 }
 0x465   :  { %v455_v19 = vmul.f32 1.442695, %v454_v16 }
 0x466   :  { %v441_v9 = vor.u32 1.1754944e-38, %v440_v11  ;;  %vm439_vm15 = vcmp.eq.f32.partialorder %v438_v6, 8.507059e+37 }
 0x467   :  { %697 = vpow2.f32 %v455_v19 }
 0x46a   :  { %v696_v1 = vpop.eup %695 }
 0x46b   :  { %v430_v2 = vmul.f32 %v696_v1, %v428_v0  ;;  %vm435_vm12 = vweird.f32 %v696_v1 }
 0x46c   :  { %vm436_vm14 = vmor %vm434_vm13, %vm435_vm12 }
 0x46d   :  { %v431_v3 = vsub.f32 1.0, %v430_v2  ;;  %v698_v26 = vpop.eup %697 }
 0x46f   :  { %v432_v4 = vmul.f32 %v696_v1, %v431_v3 }
 0x471   :  { %v433_v8 = vadd.f32 %v696_v1, %v432_v4 }
 0x473   :  { %v437_v10 = vsel %vm436_vm14, %v696_v1, %v433_v8 }
 0x474   :  { %v442_v12 = vsel %vm439_vm15, %v441_v9, %v437_v10 }
 0x475   :  { %v444_v14 = vmul.f32 1.0614054, %v442_v12 }
 0x477   :  { %v445_v15 = vadd.f32 -1.4531521, %v444_v14 }
 0x479   :  { %v446_v17 = vmul.f32 %v445_v15, %v442_v12 }
 0x47b   :  { %v447_v18 = vadd.f32 1.4214138, %v446_v17 }
 0x47d   :  { %v448_v20 = vmul.f32 %v447_v18, %v442_v12 }
 0x47f   :  { %v449_v22 = vadd.f32 -0.28449672, %v448_v20 }
 0x481   :  { %v450_v23 = vmul.f32 %v449_v22, %v442_v12 }
 0x483   :  { %v451_v24 = vadd.f32 0.2548296, %v450_v23 }
 0x485   :  { %v452_v25 = vmul.f32 %v451_v24, %v442_v12 }
 0x487   :  { %v457_v27 = vmul.f32 %v698_v26, %v452_v25 }
 0x489   :  { %v458_v28 = vsub.f32 1.0, %v457_v27 }
 0x48b   :  { %v459_v7 = vmul.f32 %v458_v28, %v425_v5 }
 0x48d   :  { %v460_v30 = vadd.f32 1.0, %v459_v7 }
 0x48f   :  { %v461_v32 = vmul.f32 %v460_v30, %v422_v29 }
 0x491   :  { %653 = vmatmul.msk.f32.vlgmr.msrb.gmra.mxu0 %vm384_vm7, %v461_v32 }
 0x50e   :  { %v494_v34 = vpop.f32.mrf.mxu0 }
 0x50f   :  { %v495_v35 = vadd.f32 %v673_v33, %v494_v34 }
 0x511   :  { %v499_v36 = vsel %vm384_vm7, %v495_v35, 0.0 }
 0x512   :  { %500 = vadd.xlane.f32.xlu0 %v499_v36 }
 0x585   :  { %v501_v37 = vpop.xlane.xlu0 %500 }
 0x586   :  { %v502_v38 = vmul.f32 %v501_v37, %v955_v31  ;;  %v676_v37 = vld [vmem:[%s1072_s21] ss:$0 sm:$0xff] }
 0x588   :  { %v503_v39 = vsub.f32 %v495_v35, %v502_v38 }
 0x58a   :  { %v504_v40 = vmul.f32 %v503_v39, %v503_v39 }
 0x58c   :  { %v505_v41 = vsel %vm384_vm7, %v504_v40, 0.0 }
 0x58d   :  { %506 = vadd.xlane.f32.xlu0 %v505_v41 }
 0x600   :  { %v507_v48 = vpop.xlane.xlu0 %506 }
 0x601   :  { %v508_v49 = vmul.f32 %v507_v48, %v955_v31 }
 0x603   :  { %v509_v51 = vadd.f32 1e-05, %v508_v49 }
 0x605   :  { %699 = vrsqrt.f32 %v509_v51  ;;  %vm516_vm0 = vweird.f32 %v509_v51 }
 0x60b   :  { %v700_v54 = vpop.eup %699 }
 0x60c   :  { %v511_v31 = vmul.f32 %v700_v54, %v509_v51  ;;  %vm517_vm3 = vweird.f32 %v700_v54 }
 0x60d   :  { %vm518_vm5 = vmor %vm516_vm0, %vm517_vm3 }
 0x60e   :  { %v512_v55 = vmul.f32 %v700_v54, %v511_v31  ;;  %v677_v31 = vld [vmem:[%s1074_s22] ss:$0 sm:$0xff] }
 0x610   :  { %v513_v56 = vmul.f32 0.5, %v512_v55 }
 0x612   :  { %v514_v57 = vsub.f32 1.5, %v513_v56 }
 0x614   :  { %v515_v58 = vmul.f32 %v700_v54, %v514_v57 }
 0x616   :  { %v519_v60 = vsel %vm518_vm5, %v700_v54, %v515_v58 }
 0x617   :  { %v520_v61 = vmul.f32 %v519_v60, %v503_v39  ;;  %v640_v60 = vpop.permute.xlu2 %639 }
 0x619   :  { %v524_v63 = vmul.f32 %v674_v59, %v520_v61 }
 0x61b   :  { %v528_v0 = vadd.f32 %v675_v62, %v524_v63 }
 0x61d   :  { %v530_v1 = vmul.f32 0.70710677, %v528_v0  ;;  %v529_v34 = vmul.f32 0.5, %v528_v0 }
 0x61f   :  { %v533_v2 = vand.u32 2147483647, %v530_v1  ;;  %vm531_vm11 = vcmp.ge.f32.partialorder %v530_v1, 0.0 }
 0x620   :  { %v532_v32 = vsel %vm531_vm11, 1.0, %v712_v45 }
 0x621   :  { %v534_v3 = vmul.f32 0.3275911, %v533_v2  ;;  %v560_v17 = vsub.f32 0.0, %v533_v2 }
 0x623   :  { %v535_v11 = vadd.f32 1.0, %v534_v3  ;;  %v561_v20 = vmul.f32 %v560_v17, %v533_v2 }
 0x625   :  { %701 = vrcp.f32 %v535_v11  ;;  %v547_v9 = vand.u32 2147483648, %v535_v11  ;;  %v545_v12 = vand.u32 2147483647, %v535_v11  ;;  %vm541_vm8 = vweird.f32 %v535_v11 }
 0x626   :  { %v562_v24 = vmul.f32 1.442695, %v561_v20 }
 0x627   :  { %v548_v14 = vor.u32 1.1754944e-38, %v547_v9  ;;  %vm546_vm10 = vcmp.eq.f32.partialorder %v545_v12, 8.507059e+37 }
 0x628   :  { %703 = vpow2.f32 %v562_v24 }
 0x62b   :  { %v702_v4 = vpop.eup %701 }
 0x62c   :  { %v537_v6 = vmul.f32 %v702_v4, %v535_v11  ;;  %vm542_vm6 = vweird.f32 %v702_v4 }
 0x62d   :  { %vm543_vm9 = vmor %vm541_vm8, %vm542_vm6 }
 0x62e   :  { %v538_v8 = vsub.f32 1.0, %v537_v6  ;;  %v704_v7 = vpop.eup %703 }
 0x630   :  { %v539_v10 = vmul.f32 %v702_v4, %v538_v8 }
 0x632   :  { %v540_v13 = vadd.f32 %v702_v4, %v539_v10 }
 0x634   :  { %v544_v15 = vsel %vm543_vm9, %v702_v4, %v540_v13 }
 0x635   :  { %v549_v16 = vsel %vm546_vm10, %v548_v14, %v544_v15 }
 0x636   :  { %v551_v18 = vmul.f32 1.0614054, %v549_v16 }
 0x638   :  { %v552_v19 = vadd.f32 -1.4531521, %v551_v18 }
 0x63a   :  { %v553_v22 = vmul.f32 %v552_v19, %v549_v16 }
 0x63c   :  { %v554_v23 = vadd.f32 1.4214138, %v553_v22 }
 0x63e   :  { %v555_v25 = vmul.f32 %v554_v23, %v549_v16 }
 0x640   :  { %v556_v26 = vadd.f32 -0.28449672, %v555_v25 }
 0x642   :  { %v557_v27 = vmul.f32 %v556_v26, %v549_v16 }
 0x644   :  { %v558_v28 = vadd.f32 0.2548296, %v557_v27 }
 0x646   :  { %v559_v5 = vmul.f32 %v558_v28, %v549_v16 }
 0x648   :  { %v564_v29 = vmul.f32 %v704_v7, %v559_v5 }
 0x64a   :  { %v565_v30 = vsub.f32 1.0, %v564_v29 }
 0x64c   :  { %v566_v33 = vmul.f32 %v565_v30, %v532_v32 }
 0x64e   :  { %v567_v35 = vadd.f32 1.0, %v566_v33 }
 0x650   :  { %v568_v36 = vmul.f32 %v567_v35, %v529_v34 }
 0x652   :  { %654 = vmatmul.msk.f32.vlgmr.msrb.gmra.mxu1 %vm384_vm7, %v568_v36 }
 0x6cf   :  { %v601_v38 = vpop.f32.mrf.mxu1 }
 0x6d0   :  { %v602_v39 = vadd.f32 %v676_v37, %v601_v38 }
 0x6d2   :  { %v606_v40 = vsel %vm219_vm2, %v602_v39, 0.0 }
 0x6d3   :  { %607 = vadd.xlane.f32.xlu0 %v606_v40 }
 0x746   :  { %v608_v41 = vpop.xlane.xlu0 %607 }
 0x747   :  { %v609_v42 = vmul.f32 %v608_v41, %v865_v21 }
 0x749   :  { %v610_v43 = vsub.f32 %v602_v39, %v609_v42 }
 0x74b   :  { %v611_v45 = vmul.f32 %v610_v43, %v610_v43 }
 0x74d   :  { %v612_v44 = vsel %vm219_vm2, %v611_v45, 0.0 }
 0x74e   :  { %613 = vadd.xlane.f32.xlu0 %v612_v44 }
 0x7c1   :  { %v614_v46 = vpop.xlane.xlu0 %613 }
 0x7c2   :  { %v615_v47 = vmul.f32 %v614_v46, %v865_v21  ;;  %v678_v21 = vld [vmem:[%s1075_s23] ss:$0 sm:$0xff] }
 0x7c4   :  { %v616_v48 = vadd.f32 1e-05, %v615_v47 }
 0x7c6   :  { %705 = vrsqrt.f32 %v616_v48  ;;  %vm623_vm12 = vweird.f32 %v616_v48 }
 0x7cc   :  { %v706_v49 = vpop.eup %705 }
 0x7cd   :  { %v618_v50 = vmul.f32 %v706_v49, %v616_v48  ;;  %vm624_vm7 = vweird.f32 %v706_v49 }
 0x7ce   :  { %vm625_vm13 = vmor %vm623_vm12, %vm624_vm7 }
 0x7cf   :  { %v619_v51 = vmul.f32 %v706_v49, %v618_v50 }
 0x7d1   :  { %v620_v52 = vmul.f32 0.5, %v619_v51 }
 0x7d3   :  { %v621_v53 = vsub.f32 1.5, %v620_v52 }
 0x7d5   :  { %v622_v54 = vmul.f32 %v706_v49, %v621_v53 }
 0x7d7   :  { %v626_v55 = vsel %vm625_vm13, %v706_v49, %v622_v54 }
 0x7d8   :  { %v627_v56 = vmul.f32 %v626_v55, %v610_v43 }
 0x7da   :  { %v631_v57 = vmul.f32 %v677_v31, %v627_v56 }
 0x7dc   :  { %v635_v58 = vadd.f32 %v678_v21, %v631_v57 }
 0x7de   :  { %707 = vtanh.f32 %v635_v58 }
 0x7e4   :  { %v708_v59 = vpop.eup %707 }
 0x7e5   :  { %637 = vst.msk [vmem:[%s1076_s24] sm:$0xff] %vm219_vm2, %v708_v59 }
 0x7e6   :  { %642 = vst.msk [vmem:[%s1076_s24] sm:$0xff] %vm333_vm4, %v640_v60 }

</bundles_post_ra>
